<compile_context>
chip_gen: v5e
topology: v5e:2x2
jax: 0.10.0
libtpu: 0.0.40
codegen_flags: <defaults>
</compile_context>

<pallas_src>
import jax
import jax.numpy as jnp
from jax.experimental import pallas as pl
from jax.experimental.pallas import tpu as pltpu

# ----------------------------- model hyper-params -----------------------------
MODEL_PARAS = dict(
    in_size_ma=3, in_size_ope=6, in_size_edge=2, in_size_global=4,
    out_size_embed=8, hidden_size_ope=16, hidden_size_glo=16,
    actor_in_dim=16, critic_in_dim=16,          # 2 * out_size_embed
    n_latent_actor=32, n_latent_critic=32,
    n_hidden_actor=3, n_hidden_critic=3,
    embed_layer=2, weight=1.0,
)


# ----------------------------- device-generation heuristics -----------------------------

def _device_kind():
    try:
        return jax.devices()[0].device_kind.lower()
    except Exception:
        return ""


# ----------------------------- fused Pallas kernel -----------------------------

def _make_fused_kernel(n_layers, w_meta, use_bf16_actor):
    """Fused forward kernel; `w_meta[key] = (row_off, rows, cols)` into the weight slab."""
    f32 = jnp.float32
    bf16 = jnp.bfloat16

    def kernel(opes_ref, mas_ref, aeo_ref, aem_ref, presol_ref, om_ref, mo_ref,
               gat_ref, pool_ref, glo_ref, slab_ref, out_ref):

        def W(key):                      # static slab slice -> (rows, cols) weight tile
            ro, r, c = w_meta[key]
            return slab_ref[ro:ro + r, :c]

        feats_o = opes_ref[...]          # (BC, O, d_ope) f32
        feats_m = mas_ref[...]           # (BC, M, d_ma)  f32
        agg_e_o = aeo_ref[...]           # (BC, O, d_edge) -- constant across layers
        agg_e_m = aem_ref[...]           # (BC, M, d_edge)
        a_presol = presol_ref[...]       # (BC, 2O, O) bf16 ([pre ; solved] stacked)
        a_om = om_ref[...]               # (BC, O, M)  bf16
        a_mo = mo_ref[...]               # (BC, M, O)  bf16

        BC, O, _ = feats_o.shape
        M = feats_m.shape[1]

        # ---------------- HGNN embedding layers ----------------
        for l in range(n_layers):
            fo_b = feats_o.astype(bf16)
            # EmdedOP: pre & solved adjacency aggregations share one bf16 MXU pass
            agg_ps = jnp.einsum('bpq,bqd->bpd', a_presol, fo_b,
                                preferred_element_type=f32)          # (BC, 2O, d)
            agg_pre = agg_ps[:, :O, :]
            agg_sol = agg_ps[:, O:, :]
            agg_ma = jnp.einsum('bom,bmd->bod', a_om, feats_m.astype(bf16),
                                preferred_element_type=f32)          # (BC, O, d_ma)
            # shared-weight 2-layer tanh MLP on batch-stacked rows (W1 pre-split per source)
            h = (jnp.dot(feats_o.reshape(BC * O, -1), W(('op_w1s', l)), preferred_element_type=f32)
                 + jnp.dot(agg_pre.reshape(BC * O, -1), W(('op_w1p', l)), preferred_element_type=f32)
                 + jnp.dot(agg_sol.reshape(BC * O, -1), W(('op_w1q', l)), preferred_element_type=f32)
                 + jnp.dot(agg_ma.reshape(BC * O, -1), W(('op_w1a', l)), preferred_element_type=f32)
                 + jnp.dot(agg_e_o.reshape(BC * O, -1), W(('op_w1e', l)), preferred_element_type=f32)
                 + W(('op_b1', l)))
            h = jnp.tanh(h)
            feats_o = jnp.tanh(jnp.dot(h, W(('op_w2', l)), preferred_element_type=f32)
                               + W(('op_b2', l))).reshape(BC, O, -1)

            # EmdedMA: single tanh layer over [self | ope-agg | edge-agg]
            agg_ope = jnp.einsum('bmo,bod->bmd', a_mo, feats_o.astype(bf16),
                                 preferred_element_type=f32)         # (BC, M, out)
            hm = (jnp.dot(feats_m.reshape(BC * M, -1), W(('ma_ws', l)), preferred_element_type=f32)
                  + jnp.dot(agg_ope.reshape(BC * M, -1), W(('ma_wo', l)), preferred_element_type=f32)
                  + jnp.dot(agg_e_m.reshape(BC * M, -1), W(('ma_we', l)), preferred_element_type=f32)
                  + W(('ma_b', l)))
            feats_m = jnp.tanh(hm).reshape(BC, M, -1)

        out_dim = feats_o.shape[-1]

        # ---------------- pooling ----------------
        h_opes_pooled = jnp.einsum('bko,bod->bkd', pool_ref[...], feats_o,
                                   preferred_element_type=f32)[:, 0, :]     # (BC, out)
        h_mas_pooled = jnp.mean(feats_m, axis=1)                            # (BC, out)

        # ---------------- global MLP (Linear -> tanh -> Linear), output pre-split ----------
        g = glo_ref[...].reshape(BC, -1)
        hg = jnp.tanh(jnp.dot(g, W('glo_w1'), preferred_element_type=f32) + W('glo_b1'))
        h_glo_j = jnp.dot(hg, W('glo_w2j'), preferred_element_type=f32) + W('glo_b2j')
        h_glo_m = jnp.dot(hg, W('glo_w2m'), preferred_element_type=f32) + W('glo_b2m')

        # ---------------- job embedding gather (one-hot matmul, bf16) ----------------
        h_jobs = jnp.einsum('bjo,bod->bjd', gat_ref[...], feats_o.astype(bf16),
                            preferred_element_type=f32)                     # (BC, J, out)
        J = h_jobs.shape[1]

        # ---------------- actor scoring ----------------
        # h_actions = [h_jobs | h_mas] + h_glo - h_pooled, folded into actor layer 1:
        #   layer1 = (h_jobs + dj) @ W1_job  +  (h_mas + dm) @ W1_mas  + b1
        dj = h_glo_j - h_opes_pooled
        dm = h_glo_m - h_mas_pooled
        u = jnp.dot((h_jobs + dj[:, None, :]).reshape(BC * J, out_dim), W('a_w1j'),
                    preferred_element_type=f32).reshape(BC, J, -1)          # (BC, J, L)
        v = jnp.dot((feats_m + dm[:, None, :]).reshape(BC * M, out_dim), W('a_w1m'),
                    preferred_element_type=f32).reshape(BC, M, -1)          # (BC, M, L)
        L = u.shape[-1]
        h1 = jnp.tanh(u[:, :, None, :] + v[:, None, :, :] + W('a_b1'))      # (BC, J, M, L)

        act_dt = bf16 if use_bf16_actor else f32
        h1c = h1.reshape(BC * J * M, L).astype(act_dt)
        aw2 = W('a_w2').astype(act_dt)
        h2 = jnp.tanh(jnp.dot(h1c, aw2, preferred_element_type=f32) + W('a_b2'))
        h2 = h2.reshape(BC, 1, J * M, L)                                    # flat lane dim
        # last actor layer has width 1: multiply by the (1, L) weight row and lane-reduce
        scores = jnp.sum(h2 * W('a_w3r'), axis=-1) + W('a_b3')              # (BC, 1, J*M)
        out_ref[...] = scores.astype(out_ref.dtype)                         # lane-dense store

    return kernel


# ----------------------------- weight packing ----------------------------------

def _pack_weight_slab(params, p):
    """Pre-split all weights and pack them into one (R, 128) f32 slab (rows 8-aligned),
    so the kernel sees a single weight DMA and unpacks with static ref slices."""
    out = p['out_size_embed']
    entries = []
    for layer in range(p['embed_layer']):
        d_ope = p['in_size_ope'] if layer == 0 else out
        d_ma = p['in_size_ma'] if layer == 0 else out
        w1, b1, w2, b2 = params['get_opes'][layer]
        entries += [(('op_w1s', layer), w1[:d_ope]),                        # self
                    (('op_w1p', layer), w1[d_ope:2 * d_ope]),               # pre-adj agg
                    (('op_w1q', layer), w1[2 * d_ope:3 * d_ope]),           # solved-adj agg
                    (('op_w1a', layer), w1[3 * d_ope:3 * d_ope + d_ma]),    # machine agg
                    (('op_w1e', layer), w1[3 * d_ope + d_ma:]),             # edge agg
                    (('op_b1', layer), b1),
                    (('op_w2', layer), w2),
                    (('op_b2', layer), b2)]
        wm, bm = params['get_mas'][layer]
        entries += [(('ma_ws', layer), wm[:d_ma]),                          # self (machines)
                    (('ma_wo', layer), wm[d_ma:d_ma + out]),                # ope agg
                    (('ma_we', layer), wm[d_ma + out:]),                    # edge agg
                    (('ma_b', layer), bm)]
    gw1, gb1, gw2, gb2 = params['glo_embed']
    entries += [('glo_w1', gw1), ('glo_b1', gb1),
                ('glo_w2j', gw2[:, :out]), ('glo_b2j', gb2[:, :out]),
                ('glo_w2m', gw2[:, out:]), ('glo_b2m', gb2[:, out:])]
    aw1, ab1, aw2, ab2, aw3, ab3 = params['actor']
    entries += [('a_w1j', aw1[:out]), ('a_w1m', aw1[out:]), ('a_b1', ab1),
                ('a_w2', aw2), ('a_b2', ab2), ('a_w3r', aw3.T), ('a_b3', ab3)]

    meta, row = {}, 0
    for key, t in entries:
        r, c = int(t.shape[0]), int(t.shape[1])
        assert c <= 128, "weight wider than one lane tile"
        meta[key] = (row, r, c)
        row += ((r + 7) // 8) * 8                    # 8-aligned row start for every tensor
    rows_total = max(((row + 7) // 8) * 8, 8)
    slab = jnp.zeros((rows_total, 128), jnp.float32)
    for key, t in entries:
        ro, r, c = meta[key]
        slab = slab.at[ro:ro + r, :c].set(t.astype(jnp.float32))
    return slab, meta


# ----------------------------- Pallas wrapper ----------------------------------

def _fused_scores(feats_opes, feats_mas, agg_edge_ope, agg_edge_ma,
                  adj_presol, adj_om, adj_mo, gather_oh, pool_w, norm_glo,
                  slab, w_meta, p):
    B, O, _ = feats_opes.shape
    M = feats_mas.shape[1]
    J = gather_oh.shape[1]
    n_layers = p['embed_layer']

    kind = _device_kind()
    is_v7 = 'v7' in kind
    n_tc = 2 if is_v7 else 1                          # v7x: 2 TensorCores; v5e/v6e: 1
    use_bf16_actor = ('v6' in kind) or is_v7          # bf16 actor tail only where it pays

    # Chunk the batch only when we really have 2 cores AND per-chunk work is non-trivial;
    # otherwise the extra sequential grid step / duplicated weight prologue is pure loss.
    n_chunks = 2 if (n_tc >= 2 and B >= 2 and B % 2 == 0 and (B // 2) * O >= 128) else 1
    BC = B // n_chunks

    batch_inputs = [feats_opes, feats_mas, agg_edge_ope, agg_edge_ma,
                    adj_presol, adj_om, adj_mo, gather_oh, pool_w, norm_glo]

    def bspec(arr):   # all batch inputs are 3-D; only the leading batch dim is chunked
        return pl.BlockSpec((BC,) + tuple(arr.shape[1:]), lambda b: (b, 0, 0))

    in_specs = [bspec(a) for a in batch_inputs]
    in_specs.append(pl.BlockSpec(tuple(slab.shape), lambda b: (0, 0)))      # weight slab

    # Explicit scoped-VMEM budget from the actual block sizes (+ intermediate headroom),
    # capped per generation (v7x: 64 MiB physical; v5e/v6e: 128 MiB).
    def _chunk_bytes(a):
        return (a.size // a.shape[0]) * BC * a.dtype.itemsize
    block_bytes = sum(_chunk_bytes(a) for a in batch_inputs) + BC * J * M * 4 + slab.size * 4
    inter_bytes = 8 * BC * max(J * M, 2 * O) * 64 * 4       # rough bound on in-kernel temps
    need = 2 * block_bytes + inter_bytes + (16 << 20)
    cap = (48 << 20) if is_v7 else (100 << 20)
    vmem_limit = int(min(max(need, 32 << 20), cap))

    out = pl.pallas_call(
        _make_fused_kernel(n_layers, w_meta, use_bf16_actor),
        out_shape=jax.ShapeDtypeStruct((B, 1, J * M), jnp.float32),
        grid=(n_chunks,),
        in_specs=in_specs,
        out_specs=pl.BlockSpec((BC, 1, J * M), lambda b: (b, 0, 0)),
        compiler_params=pltpu.CompilerParams(
            dimension_semantics=("parallel",),
            vmem_limit_bytes=vmem_limit),
    )(*batch_inputs, slab)
    return out.reshape(B, J * M)


# ----------------------------- parameter init ----------------------------------

def _linear_init(key, fan_in, fan_out):
    kw, kb = jax.random.split(key)
    lim = 1.0 / (fan_in ** 0.5)
    w = jax.random.uniform(kw, (fan_in, fan_out), jnp.float32, -lim, lim)
    b = jax.random.uniform(kb, (1, fan_out), jnp.float32, -lim, lim)   # (1, out) for kernels
    return w, b


def init_params(key, p):
    keys = iter(jax.random.split(key, 64))
    out = p['out_size_embed']
    hid_ope = p['hidden_size_ope']
    d_edge = p['in_size_edge']

    get_opes, get_mas = [], []
    for layer in range(p['embed_layer']):
        d_ope = p['in_size_ope'] if layer == 0 else out
        d_ma = p['in_size_ma'] if layer == 0 else out
        w1, b1 = _linear_init(next(keys), 3 * d_ope + d_ma + d_edge, hid_ope)
        w2, b2 = _linear_init(next(keys), hid_ope, out)
        get_opes.append((w1, b1, w2, b2))
        d_ope_ma = out                      # EmdedMA always consumes embedded opes (out_size)
        d_ma_ma = p['in_size_ma'] if layer == 0 else out
        w, b = _linear_init(next(keys), d_ma_ma + d_ope_ma + d_edge, out)
        get_mas.append((w, b))

    gw1, gb1 = _linear_init(next(keys), p['in_size_global'], p['hidden_size_glo'])
    gw2, gb2 = _linear_init(next(keys), p['hidden_size_glo'], 2 * out)
    glo_embed = (gw1, gb1, gw2, gb2)

    aw1, ab1 = _linear_init(next(keys), p['actor_in_dim'], p['n_latent_actor'])
    aw2, ab2 = _linear_init(next(keys), p['n_latent_actor'], p['n_latent_actor'])
    aw3, ab3 = _linear_init(next(keys), p['n_latent_actor'], 1)
    actor = (aw1, ab1, aw2, ab2, aw3, ab3)

    # critic is created in __init__ but unused in forward() — omitted.
    return dict(get_opes=get_opes, get_mas=get_mas, glo_embed=glo_embed, actor=actor)


# ----------------------------- forward (eval path) -----------------------------

def _masked_mean_std(x, mask, n):
    """Masked per-batch mean / unbiased std over axis 1 (matches torch.std ddof=1;
       denominators clamped so n==0 or n==1 yield 0 instead of inf/NaN)."""
    m = mask[..., None].astype(x.dtype)
    nf = jnp.maximum(n.astype(x.dtype), 1.0)[:, None, None]
    mean = jnp.sum(x * m, axis=1, keepdims=True) / nf
    var = jnp.sum(((x - mean) ** 2) * m, axis=1, keepdims=True) / jnp.maximum(nf - 1.0, 1.0)
    return mean, jnp.sqrt(jnp.maximum(var, 0.0))


def hgnn_forward(params, state, p):
    batch_idxes = state['batch_idxes']                                   # (B,)
    raw_opes = jnp.transpose(state['feat_opes_batch'], (0, 2, 1))[batch_idxes]   # (B, O, d_ope)
    raw_mas = jnp.transpose(state['feat_mas_batch'], (0, 2, 1))[batch_idxes]     # (B, M, d_ma)
    raw_edge = state['feat_edge_batch'][batch_idxes]                     # (B, O, M, d_edge)
    nums_opes = state['nums_opes_batch'][batch_idxes]                    # (B,)

    B, O, _ = raw_opes.shape
    M = raw_mas.shape[1]

    # ---- get_normalized (eval path: per-batch valid-op statistics, vectorized via masks) ----
    valid = jnp.arange(O)[None, :] < nums_opes[:, None]                  # (B, O)
    mean_opes, std_opes = _masked_mean_std(raw_opes, valid, nums_opes)
    mean_mas = jnp.mean(raw_mas, axis=1, keepdims=True)
    std_mas = jnp.sqrt(jnp.sum((raw_mas - mean_mas) ** 2, axis=1, keepdims=True)
                       / jnp.maximum(M - 1.0, 1.0))

    m4 = valid[:, :, None, None].astype(raw_edge.dtype)                  # (B, O, 1, 1)
    cnt = jnp.maximum(nums_opes.astype(raw_edge.dtype) * M, 1.0)[:, None, None, None]
    mean_e = jnp.sum(raw_edge * m4, axis=(1, 2), keepdims=True) / cnt
    var_e = (jnp.sum(((raw_edge - mean_e) ** 2) * m4, axis=(1, 2), keepdims=True)
             / jnp.maximum(cnt - 1.0, 1.0))
    std_e = jnp.sqrt(jnp.maximum(var_e, 0.0))
    feats_edge = jnp.where(valid[:, :, None, None],
                           (raw_edge - mean_e) / (std_e + 1e-5), raw_edge)

    feats_opes = (raw_opes - mean_opes) / (std_opes + 1e-5)
    feats_mas = (raw_mas - mean_mas) / (std_mas + 1e-5)

    # ---- adjacency matrices: bf16 (exact 0/1), pre & solved stacked into one tensor ----
    adj_pre = state['ope_pre_adj_batch'][batch_idxes]
    adj_sol = state['solved_pre'][batch_idxes]
    adj_presol = jnp.concatenate([adj_pre, adj_sol], axis=1).astype(jnp.bfloat16)   # (B, 2O, O)
    op_ma_adj_i = state['ope_ma_adj_batch'][batch_idxes]                 # int (B, O, M)
    adj_om = op_ma_adj_i.astype(jnp.bfloat16)
    adj_mo = jnp.swapaxes(adj_om, 1, 2)                                  # (B, M, O)

    # ---- edge aggregations are constant across embedding layers: precompute once ----
    adj_om_f = op_ma_adj_i.astype(jnp.float32)
    agg_edge_ope = jnp.einsum('bom,bome->boe', adj_om_f, feats_edge)     # (B, O, d_edge)
    agg_edge_ma = jnp.einsum('bom,bome->bme', adj_om_f, feats_edge)      # (B, M, d_edge)

    # ---- job-step clamp / one-hot gather / eligibility (cheap glue, plain JAX) ----
    ope_step = jnp.where(state['ope_step_batch'] > state['end_ope_biases_batch'],
                         state['end_ope_biases_batch'], state['ope_step_batch'])  # (Bt, J)
    ope_step_b = ope_step[batch_idxes]                                   # (B, J)
    J = ope_step_b.shape[1]
    gather_oh = jax.nn.one_hot(ope_step_b, O, dtype=jnp.bfloat16)        # exact 0/1 in bf16

    eligible_proc = jnp.take_along_axis(
        op_ma_adj_i, jnp.broadcast_to(ope_step_b[:, :, None], (B, J, M)), axis=1)
    job_eligible = ~jnp.broadcast_to(
        state['mask_job_finish_batch'][batch_idxes][:, :, None], (B, J, M))
    eligible = job_eligible & (eligible_proc == 1)                       # (B, J, M)

    # masked-mean pooling weights: 1/nums_opes on valid rows, 0 elsewhere (clamped n>=1)
    pool_w = (valid.astype(jnp.float32)
              / jnp.maximum(nums_opes.astype(jnp.float32), 1.0)[:, None])[:, None, :]  # (B,1,O)

    norm_glo = state['feat_glo_batch'][batch_idxes][:, None, :]          # (B, 1, d_glo)

    # ---- single weight slab (one DMA, static in-kernel slices) ----
    slab, w_meta = _pack_weight_slab(params, p)

    # ---- fused Pallas forward: HGNN layers + pooling + global MLP + actor scoring ----
    scores = _fused_scores(feats_opes, feats_mas, agg_edge_ope, agg_edge_ma,
                           adj_presol, adj_om, adj_mo, gather_oh, pool_w, norm_glo,
                           slab, w_meta, p)                              # (B, J*M)

    # ---- mask + greedy action (softmax is monotone -> argmax over masked scores) ----
    mask = eligible.reshape(B, J * M)
    scores = jnp.where(mask, scores, -1e9)   # large-negative sentinel: same argmax, no NaNs
    action_indexes = jnp.argmax(scores, axis=1).astype(jnp.int32)

    jobs = (action_indexes // M).astype(jnp.int32)
    mas = (action_indexes % M).astype(jnp.int32)
    opes = ope_step[batch_idxes, jobs].astype(jnp.int32)
    return jnp.stack((opes, mas, jobs), axis=1).T                        # (3, B)


# ----------------------------- demo --------------------------------------------

if __name__ == "__main__":
    p = MODEL_PARAS
    key = jax.random.PRNGKey(0)
    k_par, k_op, k_ma, k_ed, k_pre, k_sol, k_om, k_glo, k_step = jax.random.split(key, 9)

    B, O, M, J = 2, 12, 4, 3           # batches, operations, machines, jobs

    params = init_params(k_par, p)

    ope_ma_adj = (jax.random.uniform(k_om, (B, O, M)) > 0.4).astype(jnp.int32)
    ope_ma_adj = ope_ma_adj.at[:, :, 0].set(1)        # every op has >=1 eligible machine

    state = dict(
        batch_idxes=jnp.arange(B, dtype=jnp.int32),
        feat_opes_batch=jax.random.normal(k_op, (B, p['in_size_ope'], O), jnp.float32),
        feat_mas_batch=jax.random.normal(k_ma, (B, p['in_size_ma'], M), jnp.float32),
        feat_edge_batch=jax.random.uniform(k_ed, (B, O, M, p['in_size_edge']),
                                           jnp.float32, 0.0, 10.0),
        nums_opes_batch=jnp.array([10, 12], dtype=jnp.int32),
        ope_pre_adj_batch=(jax.random.uniform(k_pre, (B, O, O)) > 0.7).astype(jnp.int32),
        solved_pre=(jax.random.uniform(k_sol, (B, O, O)) > 0.7).astype(jnp.int32),
        ope_ma_adj_batch=ope_ma_adj,
        ope_step_batch=jnp.array([[0, 5, 9], [1, 4, 8]], dtype=jnp.int32),
        end_ope_biases_batch=jnp.array([[3, 7, 11], [3, 7, 11]], dtype=jnp.int32),
        mask_job_finish_batch=jnp.zeros((B, J), dtype=bool),
        feat_glo_batch=jax.random.normal(k_glo, (B, p['in_size_global']), jnp.float32),
    )

    result = hgnn_forward(params, state, p)
    jax.block_until_ready(result)
    assert result.shape == (3, B)
    print("KERNEL_OK")
</pallas_src>

<mosaic_0001>
module attributes {stable_mosaic.version = 11 : i64} {
  func.func @kernel(%arg0: i32, %arg1: memref<2x12x6xf32, #tpu.memory_space<vmem>>, %arg2: memref<2x4x3xf32, #tpu.memory_space<vmem>>, %arg3: memref<2x12x2xf32, #tpu.memory_space<vmem>>, %arg4: memref<2x4x2xf32, #tpu.memory_space<vmem>>, %arg5: memref<2x24x12xbf16, #tpu.memory_space<vmem>>, %arg6: memref<2x12x4xbf16, #tpu.memory_space<vmem>>, %arg7: memref<2x4x12xbf16, #tpu.memory_space<vmem>>, %arg8: memref<2x3x12xbf16, #tpu.memory_space<vmem>>, %arg9: memref<2x1x12xf32, #tpu.memory_space<vmem>>, %arg10: memref<2x1x4xf32, #tpu.memory_space<vmem>>, %arg11: memref<352x128xf32, #tpu.memory_space<vmem>>, %arg12: memref<2x1x12xf32, #tpu.memory_space<vmem>>) attributes {dimension_semantics = [#tpu.dimension_semantics<parallel>], iteration_bounds = array<i64: 1>, scalar_prefetch = 0 : i64, scratch_operands = 0 : i64, tpu.core_type = #tpu.core_type<tc>, window_params = [{transform_indices = @transform_0, window_bounds = array<i64: 2, 12, 6>}, {transform_indices = @transform_1, window_bounds = array<i64: 2, 4, 3>}, {transform_indices = @transform_2, window_bounds = array<i64: 2, 12, 2>}, {transform_indices = @transform_3, window_bounds = array<i64: 2, 4, 2>}, {transform_indices = @transform_4, window_bounds = array<i64: 2, 24, 12>}, {transform_indices = @transform_5, window_bounds = array<i64: 2, 12, 4>}, {transform_indices = @transform_6, window_bounds = array<i64: 2, 4, 12>}, {transform_indices = @transform_7, window_bounds = array<i64: 2, 3, 12>}, {transform_indices = @transform_8, window_bounds = array<i64: 2, 1, 12>}, {transform_indices = @transform_9, window_bounds = array<i64: 2, 1, 4>}, {pipeline_mode = #tpu.pipeline_mode<synchronous>, transform_indices = @transform_10, window_bounds = array<i64: 352, 128>}, {transform_indices = @transform_11, window_bounds = array<i64: 2, 1, 12>}]} {
    %c0 = arith.constant 0 : index
    %c0_0 = arith.constant 0 : index
    %c0_1 = arith.constant 0 : index
    %0 = vector.load %arg1[%c0, %c0_0, %c0_1] : memref<2x12x6xf32, #tpu.memory_space<vmem>>, vector<2x12x6xf32>
    %c0_2 = arith.constant 0 : index
    %c0_3 = arith.constant 0 : index
    %c0_4 = arith.constant 0 : index
    %1 = vector.load %arg2[%c0_2, %c0_3, %c0_4] : memref<2x4x3xf32, #tpu.memory_space<vmem>>, vector<2x4x3xf32>
    %c0_5 = arith.constant 0 : index
    %c0_6 = arith.constant 0 : index
    %c0_7 = arith.constant 0 : index
    %2 = vector.load %arg3[%c0_5, %c0_6, %c0_7] : memref<2x12x2xf32, #tpu.memory_space<vmem>>, vector<2x12x2xf32>
    %c0_8 = arith.constant 0 : index
    %c0_9 = arith.constant 0 : index
    %c0_10 = arith.constant 0 : index
    %3 = vector.load %arg4[%c0_8, %c0_9, %c0_10] : memref<2x4x2xf32, #tpu.memory_space<vmem>>, vector<2x4x2xf32>
    %c0_11 = arith.constant 0 : index
    %c0_12 = arith.constant 0 : index
    %c0_13 = arith.constant 0 : index
    %4 = vector.load %arg5[%c0_11, %c0_12, %c0_13] : memref<2x24x12xbf16, #tpu.memory_space<vmem>>, vector<2x24x12xbf16>
    %c0_14 = arith.constant 0 : index
    %c0_15 = arith.constant 0 : index
    %c0_16 = arith.constant 0 : index
    %5 = vector.load %arg6[%c0_14, %c0_15, %c0_16] : memref<2x12x4xbf16, #tpu.memory_space<vmem>>, vector<2x12x4xbf16>
    %c0_17 = arith.constant 0 : index
    %c0_18 = arith.constant 0 : index
    %c0_19 = arith.constant 0 : index
    %6 = vector.load %arg7[%c0_17, %c0_18, %c0_19] : memref<2x4x12xbf16, #tpu.memory_space<vmem>>, vector<2x4x12xbf16>
    %7 = arith.truncf %0 : vector<2x12x6xf32> to vector<2x12x6xbf16>
    "tpu.trace_start"() <{level = 10 : i32, message = "bpq,bqd->bpd"}> : () -> ()
    %cst = arith.constant dense<0.000000e+00> : vector<2x24x6xf32>
    %8 = tpu.matmul %4, %7, %cst {dimension_numbers = #tpu.dot_dimension_numbers<[2], [1], [1], [2], [0, 0, 0, 1, 1, 2], [0], [0]>} : vector<2x24x12xbf16>, vector<2x12x6xbf16>, vector<2x24x6xf32> -> vector<2x24x6xf32>
    "tpu.trace_stop"() : () -> ()
    %9 = vector.extract_strided_slice %8 {offsets = [0, 0, 0], sizes = [2, 12, 6], strides = [1, 1, 1]} : vector<2x24x6xf32> to vector<2x12x6xf32>
    %10 = vector.extract_strided_slice %8 {offsets = [0, 12, 0], sizes = [2, 12, 6], strides = [1, 1, 1]} : vector<2x24x6xf32> to vector<2x12x6xf32>
    %11 = arith.truncf %1 : vector<2x4x3xf32> to vector<2x4x3xbf16>
    "tpu.trace_start"() <{level = 10 : i32, message = "bom,bmd->bod"}> : () -> ()
    %cst_20 = arith.constant dense<0.000000e+00> : vector<2x12x3xf32>
    %12 = tpu.matmul %5, %11, %cst_20 {dimension_numbers = #tpu.dot_dimension_numbers<[2], [1], [1], [2], [0, 0, 0, 1, 1, 2], [0], [0]>} : vector<2x12x4xbf16>, vector<2x4x3xbf16>, vector<2x12x3xf32> -> vector<2x12x3xf32>
    "tpu.trace_stop"() : () -> ()
    %13 = vector.shape_cast %0 : vector<2x12x6xf32> to vector<24x6xf32>
    %c0_21 = arith.constant 0 : index
    %c0_22 = arith.constant 0 : index
    %14 = vector.load %arg11[%c0_21, %c0_22] : memref<352x128xf32, #tpu.memory_space<vmem>>, vector<6x16xf32>
    %cst_23 = arith.constant dense<0.000000e+00> : vector<24x16xf32>
    %15 = tpu.matmul %13, %14, %cst_23 {dimension_numbers = #tpu.dot_dimension_numbers<[1], [0], [0], [1], [0, 0, 1, 1], [], []>} : vector<24x6xf32>, vector<6x16xf32>, vector<24x16xf32> -> vector<24x16xf32>
    %16 = vector.shape_cast %9 : vector<2x12x6xf32> to vector<24x6xf32>
    %c8 = arith.constant 8 : index
    %c0_24 = arith.constant 0 : index
    %17 = vector.load %arg11[%c8, %c0_24] : memref<352x128xf32, #tpu.memory_space<vmem>>, vector<6x16xf32>
    %cst_25 = arith.constant dense<0.000000e+00> : vector<24x16xf32>
    %18 = tpu.matmul %16, %17, %cst_25 {dimension_numbers = #tpu.dot_dimension_numbers<[1], [0], [0], [1], [0, 0, 1, 1], [], []>} : vector<24x6xf32>, vector<6x16xf32>, vector<24x16xf32> -> vector<24x16xf32>
    %19 = arith.addf %15, %18 : vector<24x16xf32>
    %20 = vector.shape_cast %10 : vector<2x12x6xf32> to vector<24x6xf32>
    %c16 = arith.constant 16 : index
    %c0_26 = arith.constant 0 : index
    %21 = vector.load %arg11[%c16, %c0_26] : memref<352x128xf32, #tpu.memory_space<vmem>>, vector<6x16xf32>
    %cst_27 = arith.constant dense<0.000000e+00> : vector<24x16xf32>
    %22 = tpu.matmul %20, %21, %cst_27 {dimension_numbers = #tpu.dot_dimension_numbers<[1], [0], [0], [1], [0, 0, 1, 1], [], []>} : vector<24x6xf32>, vector<6x16xf32>, vector<24x16xf32> -> vector<24x16xf32>
    %23 = arith.addf %19, %22 : vector<24x16xf32>
    %24 = vector.shape_cast %12 : vector<2x12x3xf32> to vector<24x3xf32>
    %c24 = arith.constant 24 : index
    %c0_28 = arith.constant 0 : index
    %25 = vector.load %arg11[%c24, %c0_28] : memref<352x128xf32, #tpu.memory_space<vmem>>, vector<3x16xf32>
    %cst_29 = arith.constant dense<0.000000e+00> : vector<24x16xf32>
    %26 = tpu.matmul %24, %25, %cst_29 {dimension_numbers = #tpu.dot_dimension_numbers<[1], [0], [0], [1], [0, 0, 1, 1], [], []>} : vector<24x3xf32>, vector<3x16xf32>, vector<24x16xf32> -> vector<24x16xf32>
    %27 = arith.addf %23, %26 : vector<24x16xf32>
    %28 = vector.shape_cast %2 : vector<2x12x2xf32> to vector<24x2xf32>
    %c32 = arith.constant 32 : index
    %c0_30 = arith.constant 0 : index
    %29 = vector.load %arg11[%c32, %c0_30] : memref<352x128xf32, #tpu.memory_space<vmem>>, vector<2x16xf32>
    %cst_31 = arith.constant dense<0.000000e+00> : vector<24x16xf32>
    %30 = tpu.matmul %28, %29, %cst_31 {dimension_numbers = #tpu.dot_dimension_numbers<[1], [0], [0], [1], [0, 0, 1, 1], [], []>} : vector<24x2xf32>, vector<2x16xf32>, vector<24x16xf32> -> vector<24x16xf32>
    %31 = arith.addf %27, %30 : vector<24x16xf32>
    %c40 = arith.constant 40 : index
    %c0_32 = arith.constant 0 : index
    %32 = vector.load %arg11[%c40, %c0_32] : memref<352x128xf32, #tpu.memory_space<vmem>>, vector<1x16xf32>
    %33 = vector.broadcast %32 : vector<1x16xf32> to vector<24x16xf32>
    %34 = arith.addf %31, %33 : vector<24x16xf32>
    %35 = math.tanh %34 : vector<24x16xf32>
    %c48 = arith.constant 48 : index
    %c0_33 = arith.constant 0 : index
    %36 = vector.load %arg11[%c48, %c0_33] : memref<352x128xf32, #tpu.memory_space<vmem>>, vector<16x8xf32>
    %cst_34 = arith.constant dense<0.000000e+00> : vector<24x8xf32>
    %37 = tpu.matmul %35, %36, %cst_34 {dimension_numbers = #tpu.dot_dimension_numbers<[1], [0], [0], [1], [0, 0, 1, 1], [], []>} : vector<24x16xf32>, vector<16x8xf32>, vector<24x8xf32> -> vector<24x8xf32>
    %c64 = arith.constant 64 : index
    %c0_35 = arith.constant 0 : index
    %38 = vector.load %arg11[%c64, %c0_35] : memref<352x128xf32, #tpu.memory_space<vmem>>, vector<1x8xf32>
    %39 = vector.broadcast %38 : vector<1x8xf32> to vector<24x8xf32>
    %40 = arith.addf %37, %39 : vector<24x8xf32>
    %41 = math.tanh %40 : vector<24x8xf32>
    %42 = vector.shape_cast %41 : vector<24x8xf32> to vector<2x12x8xf32>
    %43 = arith.truncf %42 : vector<2x12x8xf32> to vector<2x12x8xbf16>
    "tpu.trace_start"() <{level = 10 : i32, message = "bmo,bod->bmd"}> : () -> ()
    %cst_36 = arith.constant dense<0.000000e+00> : vector<2x4x8xf32>
    %44 = tpu.matmul %6, %43, %cst_36 {dimension_numbers = #tpu.dot_dimension_numbers<[2], [1], [1], [2], [0, 0, 0, 1, 1, 2], [0], [0]>} : vector<2x4x12xbf16>, vector<2x12x8xbf16>, vector<2x4x8xf32> -> vector<2x4x8xf32>
    "tpu.trace_stop"() : () -> ()
    %45 = vector.shape_cast %1 : vector<2x4x3xf32> to vector<8x3xf32>
    %c72 = arith.constant 72 : index
    %c0_37 = arith.constant 0 : index
    %46 = vector.load %arg11[%c72, %c0_37] : memref<352x128xf32, #tpu.memory_space<vmem>>, vector<3x8xf32>
    %cst_38 = arith.constant dense<0.000000e+00> : vector<8x8xf32>
    %47 = tpu.matmul %45, %46, %cst_38 {dimension_numbers = #tpu.dot_dimension_numbers<[1], [0], [0], [1], [0, 0, 1, 1], [], []>} : vector<8x3xf32>, vector<3x8xf32>, vector<8x8xf32> -> vector<8x8xf32>
    %48 = vector.shape_cast %44 : vector<2x4x8xf32> to vector<8x8xf32>
    %c80 = arith.constant 80 : index
    %c0_39 = arith.constant 0 : index
    %49 = vector.load %arg11[%c80, %c0_39] : memref<352x128xf32, #tpu.memory_space<vmem>>, vector<8x8xf32>
    %cst_40 = arith.constant dense<0.000000e+00> : vector<8x8xf32>
    %50 = tpu.matmul %48, %49, %cst_40 {dimension_numbers = #tpu.dot_dimension_numbers<[1], [0], [0], [1], [0, 0, 1, 1], [], []>} : vector<8x8xf32>, vector<8x8xf32>, vector<8x8xf32> -> vector<8x8xf32>
    %51 = arith.addf %47, %50 : vector<8x8xf32>
    %52 = vector.shape_cast %3 : vector<2x4x2xf32> to vector<8x2xf32>
    %c88 = arith.constant 88 : index
    %c0_41 = arith.constant 0 : index
    %53 = vector.load %arg11[%c88, %c0_41] : memref<352x128xf32, #tpu.memory_space<vmem>>, vector<2x8xf32>
    %cst_42 = arith.constant dense<0.000000e+00> : vector<8x8xf32>
    %54 = tpu.matmul %52, %53, %cst_42 {dimension_numbers = #tpu.dot_dimension_numbers<[1], [0], [0], [1], [0, 0, 1, 1], [], []>} : vector<8x2xf32>, vector<2x8xf32>, vector<8x8xf32> -> vector<8x8xf32>
    %55 = arith.addf %51, %54 : vector<8x8xf32>
    %c96 = arith.constant 96 : index
    %c0_43 = arith.constant 0 : index
    %56 = vector.load %arg11[%c96, %c0_43] : memref<352x128xf32, #tpu.memory_space<vmem>>, vector<1x8xf32>
    %57 = vector.broadcast %56 : vector<1x8xf32> to vector<8x8xf32>
    %58 = arith.addf %55, %57 : vector<8x8xf32>
    %59 = math.tanh %58 : vector<8x8xf32>
    %60 = vector.shape_cast %59 : vector<8x8xf32> to vector<2x4x8xf32>
    %61 = arith.truncf %42 : vector<2x12x8xf32> to vector<2x12x8xbf16>
    "tpu.trace_start"() <{level = 10 : i32, message = "bpq,bqd->bpd"}> : () -> ()
    %cst_44 = arith.constant dense<0.000000e+00> : vector<2x24x8xf32>
    %62 = tpu.matmul %4, %61, %cst_44 {dimension_numbers = #tpu.dot_dimension_numbers<[2], [1], [1], [2], [0, 0, 0, 1, 1, 2], [0], [0]>} : vector<2x24x12xbf16>, vector<2x12x8xbf16>, vector<2x24x8xf32> -> vector<2x24x8xf32>
    "tpu.trace_stop"() : () -> ()
    %63 = vector.extract_strided_slice %62 {offsets = [0, 0, 0], sizes = [2, 12, 8], strides = [1, 1, 1]} : vector<2x24x8xf32> to vector<2x12x8xf32>
    %64 = vector.extract_strided_slice %62 {offsets = [0, 12, 0], sizes = [2, 12, 8], strides = [1, 1, 1]} : vector<2x24x8xf32> to vector<2x12x8xf32>
    %65 = arith.truncf %60 : vector<2x4x8xf32> to vector<2x4x8xbf16>
    "tpu.trace_start"() <{level = 10 : i32, message = "bom,bmd->bod"}> : () -> ()
    %cst_45 = arith.constant dense<0.000000e+00> : vector<2x12x8xf32>
    %66 = tpu.matmul %5, %65, %cst_45 {dimension_numbers = #tpu.dot_dimension_numbers<[2], [1], [1], [2], [0, 0, 0, 1, 1, 2], [0], [0]>} : vector<2x12x4xbf16>, vector<2x4x8xbf16>, vector<2x12x8xf32> -> vector<2x12x8xf32>
    "tpu.trace_stop"() : () -> ()
    %67 = vector.shape_cast %42 : vector<2x12x8xf32> to vector<24x8xf32>
    %c104 = arith.constant 104 : index
    %c0_46 = arith.constant 0 : index
    %68 = vector.load %arg11[%c104, %c0_46] : memref<352x128xf32, #tpu.memory_space<vmem>>, vector<8x16xf32>
    %cst_47 = arith.constant dense<0.000000e+00> : vector<24x16xf32>
    %69 = tpu.matmul %67, %68, %cst_47 {dimension_numbers = #tpu.dot_dimension_numbers<[1], [0], [0], [1], [0, 0, 1, 1], [], []>} : vector<24x8xf32>, vector<8x16xf32>, vector<24x16xf32> -> vector<24x16xf32>
    %70 = vector.shape_cast %63 : vector<2x12x8xf32> to vector<24x8xf32>
    %c112 = arith.constant 112 : index
    %c0_48 = arith.constant 0 : index
    %71 = vector.load %arg11[%c112, %c0_48] : memref<352x128xf32, #tpu.memory_space<vmem>>, vector<8x16xf32>
    %cst_49 = arith.constant dense<0.000000e+00> : vector<24x16xf32>
    %72 = tpu.matmul %70, %71, %cst_49 {dimension_numbers = #tpu.dot_dimension_numbers<[1], [0], [0], [1], [0, 0, 1, 1], [], []>} : vector<24x8xf32>, vector<8x16xf32>, vector<24x16xf32> -> vector<24x16xf32>
    %73 = arith.addf %69, %72 : vector<24x16xf32>
    %74 = vector.shape_cast %64 : vector<2x12x8xf32> to vector<24x8xf32>
    %c120 = arith.constant 120 : index
    %c0_50 = arith.constant 0 : index
    %75 = vector.load %arg11[%c120, %c0_50] : memref<352x128xf32, #tpu.memory_space<vmem>>, vector<8x16xf32>
    %cst_51 = arith.constant dense<0.000000e+00> : vector<24x16xf32>
    %76 = tpu.matmul %74, %75, %cst_51 {dimension_numbers = #tpu.dot_dimension_numbers<[1], [0], [0], [1], [0, 0, 1, 1], [], []>} : vector<24x8xf32>, vector<8x16xf32>, vector<24x16xf32> -> vector<24x16xf32>
    %77 = arith.addf %73, %76 : vector<24x16xf32>
    %78 = vector.shape_cast %66 : vector<2x12x8xf32> to vector<24x8xf32>
    %c128 = arith.constant 128 : index
    %c0_52 = arith.constant 0 : index
    %79 = vector.load %arg11[%c128, %c0_52] : memref<352x128xf32, #tpu.memory_space<vmem>>, vector<8x16xf32>
    %cst_53 = arith.constant dense<0.000000e+00> : vector<24x16xf32>
    %80 = tpu.matmul %78, %79, %cst_53 {dimension_numbers = #tpu.dot_dimension_numbers<[1], [0], [0], [1], [0, 0, 1, 1], [], []>} : vector<24x8xf32>, vector<8x16xf32>, vector<24x16xf32> -> vector<24x16xf32>
    %81 = arith.addf %77, %80 : vector<24x16xf32>
    %82 = vector.shape_cast %2 : vector<2x12x2xf32> to vector<24x2xf32>
    %c136 = arith.constant 136 : index
    %c0_54 = arith.constant 0 : index
    %83 = vector.load %arg11[%c136, %c0_54] : memref<352x128xf32, #tpu.memory_space<vmem>>, vector<2x16xf32>
    %cst_55 = arith.constant dense<0.000000e+00> : vector<24x16xf32>
    %84 = tpu.matmul %82, %83, %cst_55 {dimension_numbers = #tpu.dot_dimension_numbers<[1], [0], [0], [1], [0, 0, 1, 1], [], []>} : vector<24x2xf32>, vector<2x16xf32>, vector<24x16xf32> -> vector<24x16xf32>
    %85 = arith.addf %81, %84 : vector<24x16xf32>
    %c144 = arith.constant 144 : index
    %c0_56 = arith.constant 0 : index
    %86 = vector.load %arg11[%c144, %c0_56] : memref<352x128xf32, #tpu.memory_space<vmem>>, vector<1x16xf32>
    %87 = vector.broadcast %86 : vector<1x16xf32> to vector<24x16xf32>
    %88 = arith.addf %85, %87 : vector<24x16xf32>
    %89 = math.tanh %88 : vector<24x16xf32>
    %c152 = arith.constant 152 : index
    %c0_57 = arith.constant 0 : index
    %90 = vector.load %arg11[%c152, %c0_57] : memref<352x128xf32, #tpu.memory_space<vmem>>, vector<16x8xf32>
    %cst_58 = arith.constant dense<0.000000e+00> : vector<24x8xf32>
    %91 = tpu.matmul %89, %90, %cst_58 {dimension_numbers = #tpu.dot_dimension_numbers<[1], [0], [0], [1], [0, 0, 1, 1], [], []>} : vector<24x16xf32>, vector<16x8xf32>, vector<24x8xf32> -> vector<24x8xf32>
    %c168 = arith.constant 168 : index
    %c0_59 = arith.constant 0 : index
    %92 = vector.load %arg11[%c168, %c0_59] : memref<352x128xf32, #tpu.memory_space<vmem>>, vector<1x8xf32>
    %93 = vector.broadcast %92 : vector<1x8xf32> to vector<24x8xf32>
    %94 = arith.addf %91, %93 : vector<24x8xf32>
    %95 = math.tanh %94 : vector<24x8xf32>
    %96 = vector.shape_cast %95 : vector<24x8xf32> to vector<2x12x8xf32>
    %97 = arith.truncf %96 : vector<2x12x8xf32> to vector<2x12x8xbf16>
    "tpu.trace_start"() <{level = 10 : i32, message = "bmo,bod->bmd"}> : () -> ()
    %cst_60 = arith.constant dense<0.000000e+00> : vector<2x4x8xf32>
    %98 = tpu.matmul %6, %97, %cst_60 {dimension_numbers = #tpu.dot_dimension_numbers<[2], [1], [1], [2], [0, 0, 0, 1, 1, 2], [0], [0]>} : vector<2x4x12xbf16>, vector<2x12x8xbf16>, vector<2x4x8xf32> -> vector<2x4x8xf32>
    "tpu.trace_stop"() : () -> ()
    %99 = vector.shape_cast %60 : vector<2x4x8xf32> to vector<8x8xf32>
    %c176 = arith.constant 176 : index
    %c0_61 = arith.constant 0 : index
    %100 = vector.load %arg11[%c176, %c0_61] : memref<352x128xf32, #tpu.memory_space<vmem>>, vector<8x8xf32>
    %cst_62 = arith.constant dense<0.000000e+00> : vector<8x8xf32>
    %101 = tpu.matmul %99, %100, %cst_62 {dimension_numbers = #tpu.dot_dimension_numbers<[1], [0], [0], [1], [0, 0, 1, 1], [], []>} : vector<8x8xf32>, vector<8x8xf32>, vector<8x8xf32> -> vector<8x8xf32>
    %102 = vector.shape_cast %98 : vector<2x4x8xf32> to vector<8x8xf32>
    %c184 = arith.constant 184 : index
    %c0_63 = arith.constant 0 : index
    %103 = vector.load %arg11[%c184, %c0_63] : memref<352x128xf32, #tpu.memory_space<vmem>>, vector<8x8xf32>
    %cst_64 = arith.constant dense<0.000000e+00> : vector<8x8xf32>
    %104 = tpu.matmul %102, %103, %cst_64 {dimension_numbers = #tpu.dot_dimension_numbers<[1], [0], [0], [1], [0, 0, 1, 1], [], []>} : vector<8x8xf32>, vector<8x8xf32>, vector<8x8xf32> -> vector<8x8xf32>
    %105 = arith.addf %101, %104 : vector<8x8xf32>
    %106 = vector.shape_cast %3 : vector<2x4x2xf32> to vector<8x2xf32>
    %c192 = arith.constant 192 : index
    %c0_65 = arith.constant 0 : index
    %107 = vector.load %arg11[%c192, %c0_65] : memref<352x128xf32, #tpu.memory_space<vmem>>, vector<2x8xf32>
    %cst_66 = arith.constant dense<0.000000e+00> : vector<8x8xf32>
    %108 = tpu.matmul %106, %107, %cst_66 {dimension_numbers = #tpu.dot_dimension_numbers<[1], [0], [0], [1], [0, 0, 1, 1], [], []>} : vector<8x2xf32>, vector<2x8xf32>, vector<8x8xf32> -> vector<8x8xf32>
    %109 = arith.addf %105, %108 : vector<8x8xf32>
    %c200 = arith.constant 200 : index
    %c0_67 = arith.constant 0 : index
    %110 = vector.load %arg11[%c200, %c0_67] : memref<352x128xf32, #tpu.memory_space<vmem>>, vector<1x8xf32>
    %111 = vector.broadcast %110 : vector<1x8xf32> to vector<8x8xf32>
    %112 = arith.addf %109, %111 : vector<8x8xf32>
    %113 = math.tanh %112 : vector<8x8xf32>
    %114 = vector.shape_cast %113 : vector<8x8xf32> to vector<2x4x8xf32>
    %c0_68 = arith.constant 0 : index
    %c0_69 = arith.constant 0 : index
    %c0_70 = arith.constant 0 : index
    %115 = vector.load %arg9[%c0_68, %c0_69, %c0_70] : memref<2x1x12xf32, #tpu.memory_space<vmem>>, vector<2x1x12xf32>
    "tpu.trace_start"() <{level = 10 : i32, message = "bko,bod->bkd"}> : () -> ()
    %cst_71 = arith.constant dense<0.000000e+00> : vector<2x1x8xf32>
    %116 = tpu.matmul %115, %96, %cst_71 {dimension_numbers = #tpu.dot_dimension_numbers<[2], [1], [1], [2], [0, 0, 0, 1, 1, 2], [0], [0]>} : vector<2x1x12xf32>, vector<2x12x8xf32>, vector<2x1x8xf32> -> vector<2x1x8xf32>
    "tpu.trace_stop"() : () -> ()
    %117 = vector.shape_cast %116 : vector<2x1x8xf32> to vector<2x8xf32>
    %cst_72 = arith.constant dense<0.000000e+00> : vector<2x8xf32>
    %118 = vector.multi_reduction <add>, %114, %cst_72 [1] : vector<2x4x8xf32> to vector<2x8xf32>
    %cst_73 = arith.constant 4.000000e+00 : f32
    %119 = vector.broadcast %cst_73 : f32 to vector<2x8xf32>
    %120 = arith.divf %118, %119 : vector<2x8xf32>
    %c0_74 = arith.constant 0 : index
    %c0_75 = arith.constant 0 : index
    %c0_76 = arith.constant 0 : index
    %121 = vector.load %arg10[%c0_74, %c0_75, %c0_76] : memref<2x1x4xf32, #tpu.memory_space<vmem>>, vector<2x1x4xf32>
    %122 = vector.shape_cast %121 : vector<2x1x4xf32> to vector<2x4xf32>
    %c208 = arith.constant 208 : index
    %c0_77 = arith.constant 0 : index
    %123 = vector.load %arg11[%c208, %c0_77] : memref<352x128xf32, #tpu.memory_space<vmem>>, vector<4x16xf32>
    %cst_78 = arith.constant dense<0.000000e+00> : vector<2x16xf32>
    %124 = tpu.matmul %122, %123, %cst_78 {dimension_numbers = #tpu.dot_dimension_numbers<[1], [0], [0], [1], [0, 0, 1, 1], [], []>} : vector<2x4xf32>, vector<4x16xf32>, vector<2x16xf32> -> vector<2x16xf32>
    %c216 = arith.constant 216 : index
    %c0_79 = arith.constant 0 : index
    %125 = vector.load %arg11[%c216, %c0_79] : memref<352x128xf32, #tpu.memory_space<vmem>>, vector<1x16xf32>
    %126 = vector.broadcast %125 : vector<1x16xf32> to vector<2x16xf32>
    %127 = arith.addf %124, %126 : vector<2x16xf32>
    %128 = math.tanh %127 : vector<2x16xf32>
    %c224 = arith.constant 224 : index
    %c0_80 = arith.constant 0 : index
    %129 = vector.load %arg11[%c224, %c0_80] : memref<352x128xf32, #tpu.memory_space<vmem>>, vector<16x8xf32>
    %cst_81 = arith.constant dense<0.000000e+00> : vector<2x8xf32>
    %130 = tpu.matmul %128, %129, %cst_81 {dimension_numbers = #tpu.dot_dimension_numbers<[1], [0], [0], [1], [0, 0, 1, 1], [], []>} : vector<2x16xf32>, vector<16x8xf32>, vector<2x8xf32> -> vector<2x8xf32>
    %c240 = arith.constant 240 : index
    %c0_82 = arith.constant 0 : index
    %131 = vector.load %arg11[%c240, %c0_82] : memref<352x128xf32, #tpu.memory_space<vmem>>, vector<1x8xf32>
    %132 = vector.broadcast %131 : vector<1x8xf32> to vector<2x8xf32>
    %133 = arith.addf %130, %132 : vector<2x8xf32>
    %c248 = arith.constant 248 : index
    %c0_83 = arith.constant 0 : index
    %134 = vector.load %arg11[%c248, %c0_83] : memref<352x128xf32, #tpu.memory_space<vmem>>, vector<16x8xf32>
    %cst_84 = arith.constant dense<0.000000e+00> : vector<2x8xf32>
    %135 = tpu.matmul %128, %134, %cst_84 {dimension_numbers = #tpu.dot_dimension_numbers<[1], [0], [0], [1], [0, 0, 1, 1], [], []>} : vector<2x16xf32>, vector<16x8xf32>, vector<2x8xf32> -> vector<2x8xf32>
    %c264 = arith.constant 264 : index
    %c0_85 = arith.constant 0 : index
    %136 = vector.load %arg11[%c264, %c0_85] : memref<352x128xf32, #tpu.memory_space<vmem>>, vector<1x8xf32>
    %137 = vector.broadcast %136 : vector<1x8xf32> to vector<2x8xf32>
    %138 = arith.addf %135, %137 : vector<2x8xf32>
    %c0_86 = arith.constant 0 : index
    %c0_87 = arith.constant 0 : index
    %c0_88 = arith.constant 0 : index
    %139 = vector.load %arg8[%c0_86, %c0_87, %c0_88] : memref<2x3x12xbf16, #tpu.memory_space<vmem>>, vector<2x3x12xbf16>
    %140 = arith.truncf %96 : vector<2x12x8xf32> to vector<2x12x8xbf16>
    "tpu.trace_start"() <{level = 10 : i32, message = "bjo,bod->bjd"}> : () -> ()
    %cst_89 = arith.constant dense<0.000000e+00> : vector<2x3x8xf32>
    %141 = tpu.matmul %139, %140, %cst_89 {dimension_numbers = #tpu.dot_dimension_numbers<[2], [1], [1], [2], [0, 0, 0, 1, 1, 2], [0], [0]>} : vector<2x3x12xbf16>, vector<2x12x8xbf16>, vector<2x3x8xf32> -> vector<2x3x8xf32>
    "tpu.trace_stop"() : () -> ()
    %142 = arith.subf %133, %117 : vector<2x8xf32>
    %143 = arith.subf %138, %120 : vector<2x8xf32>
    %144 = vector.shape_cast %142 : vector<2x8xf32> to vector<2x1x8xf32>
    %145 = vector.broadcast %144 : vector<2x1x8xf32> to vector<2x3x8xf32>
    %146 = arith.addf %141, %145 : vector<2x3x8xf32>
    %147 = vector.shape_cast %146 : vector<2x3x8xf32> to vector<6x8xf32>
    %c272 = arith.constant 272 : index
    %c0_90 = arith.constant 0 : index
    %148 = vector.load %arg11[%c272, %c0_90] : memref<352x128xf32, #tpu.memory_space<vmem>>, vector<8x32xf32>
    %cst_91 = arith.constant dense<0.000000e+00> : vector<6x32xf32>
    %149 = tpu.matmul %147, %148, %cst_91 {dimension_numbers = #tpu.dot_dimension_numbers<[1], [0], [0], [1], [0, 0, 1, 1], [], []>} : vector<6x8xf32>, vector<8x32xf32>, vector<6x32xf32> -> vector<6x32xf32>
    %150 = vector.shape_cast %149 : vector<6x32xf32> to vector<2x3x32xf32>
    %151 = vector.shape_cast %143 : vector<2x8xf32> to vector<2x1x8xf32>
    %152 = vector.broadcast %151 : vector<2x1x8xf32> to vector<2x4x8xf32>
    %153 = arith.addf %114, %152 : vector<2x4x8xf32>
    %154 = vector.shape_cast %153 : vector<2x4x8xf32> to vector<8x8xf32>
    %c280 = arith.constant 280 : index
    %c0_92 = arith.constant 0 : index
    %155 = vector.load %arg11[%c280, %c0_92] : memref<352x128xf32, #tpu.memory_space<vmem>>, vector<8x32xf32>
    %cst_93 = arith.constant dense<0.000000e+00> : vector<8x32xf32>
    %156 = tpu.matmul %154, %155, %cst_93 {dimension_numbers = #tpu.dot_dimension_numbers<[1], [0], [0], [1], [0, 0, 1, 1], [], []>} : vector<8x8xf32>, vector<8x32xf32>, vector<8x32xf32> -> vector<8x32xf32>
    %157 = vector.shape_cast %156 : vector<8x32xf32> to vector<2x4x32xf32>
    %158 = vector.shape_cast %150 : vector<2x3x32xf32> to vector<2x3x1x32xf32>
    %159 = vector.shape_cast %157 : vector<2x4x32xf32> to vector<2x1x4x32xf32>
    %160 = vector.broadcast %158 : vector<2x3x1x32xf32> to vector<2x3x4x32xf32>
    %161 = vector.broadcast %159 : vector<2x1x4x32xf32> to vector<2x3x4x32xf32>
    %162 = arith.addf %160, %161 : vector<2x3x4x32xf32>
    %c288 = arith.constant 288 : index
    %c0_94 = arith.constant 0 : index
    %163 = vector.load %arg11[%c288, %c0_94] : memref<352x128xf32, #tpu.memory_space<vmem>>, vector<1x32xf32>
    %164 = vector.shape_cast %163 : vector<1x32xf32> to vector<1x1x1x32xf32>
    %165 = vector.broadcast %164 : vector<1x1x1x32xf32> to vector<2x3x4x32xf32>
    %166 = arith.addf %162, %165 : vector<2x3x4x32xf32>
    %167 = math.tanh %166 : vector<2x3x4x32xf32>
    %168 = vector.shape_cast %167 : vector<2x3x4x32xf32> to vector<24x32xf32>
    %c296 = arith.constant 296 : index
    %c0_95 = arith.constant 0 : index
    %169 = vector.load %arg11[%c296, %c0_95] : memref<352x128xf32, #tpu.memory_space<vmem>>, vector<32x32xf32>
    %cst_96 = arith.constant dense<0.000000e+00> : vector<24x32xf32>
    %170 = tpu.matmul %168, %169, %cst_96 {dimension_numbers = #tpu.dot_dimension_numbers<[1], [0], [0], [1], [0, 0, 1, 1], [], []>} : vector<24x32xf32>, vector<32x32xf32>, vector<24x32xf32> -> vector<24x32xf32>
    %c328 = arith.constant 328 : index
    %c0_97 = arith.constant 0 : index
    %171 = vector.load %arg11[%c328, %c0_97] : memref<352x128xf32, #tpu.memory_space<vmem>>, vector<1x32xf32>
    %172 = vector.broadcast %171 : vector<1x32xf32> to vector<24x32xf32>
    %173 = arith.addf %170, %172 : vector<24x32xf32>
    %174 = math.tanh %173 : vector<24x32xf32>
    %175 = vector.shape_cast %174 : vector<24x32xf32> to vector<2x1x12x32xf32>
    %c336 = arith.constant 336 : index
    %c0_98 = arith.constant 0 : index
    %176 = vector.load %arg11[%c336, %c0_98] : memref<352x128xf32, #tpu.memory_space<vmem>>, vector<1x32xf32>
    %177 = vector.shape_cast %176 : vector<1x32xf32> to vector<1x1x1x32xf32>
    %178 = vector.broadcast %177 : vector<1x1x1x32xf32> to vector<2x1x12x32xf32>
    %179 = arith.mulf %175, %178 : vector<2x1x12x32xf32>
    %cst_99 = arith.constant dense<0.000000e+00> : vector<2x1x12xf32>
    %180 = vector.multi_reduction <add>, %179, %cst_99 [3] : vector<2x1x12x32xf32> to vector<2x1x12xf32>
    %c344 = arith.constant 344 : index
    %c0_100 = arith.constant 0 : index
    %181 = vector.load %arg11[%c344, %c0_100] : memref<352x128xf32, #tpu.memory_space<vmem>>, vector<1x1xf32>
    %182 = vector.shape_cast %181 : vector<1x1xf32> to vector<1x1x1xf32>
    %183 = vector.broadcast %182 : vector<1x1x1xf32> to vector<2x1x12xf32>
    %184 = arith.addf %180, %183 : vector<2x1x12xf32>
    %c0_101 = arith.constant 0 : index
    %c0_102 = arith.constant 0 : index
    %c0_103 = arith.constant 0 : index
    %185 = vector.load %arg12[%c0_101, %c0_102, %c0_103] : memref<2x1x12xf32, #tpu.memory_space<vmem>>, vector<2x1x12xf32>
    tpu.vector_store %arg12[%c0_101, %c0_102, %c0_103], %184 {strides = array<i32>} : memref<2x1x12xf32, #tpu.memory_space<vmem>>, vector<2x1x12xf32>,
    return
  }
  func.func @transform_0(%arg0: i32) -> (i32, i32, i32) {
    %c0_i32 = arith.constant 0 : i32
    %c0_i32_0 = arith.constant 0 : i32
    %c0_i32_1 = arith.constant 0 : i32
    return %arg0, %c0_i32, %c0_i32_0 : i32, i32, i32
  }
  func.func @transform_1(%arg0: i32) -> (i32, i32, i32) {
    %c0_i32 = arith.constant 0 : i32
    %c0_i32_0 = arith.constant 0 : i32
    %c0_i32_1 = arith.constant 0 : i32
    return %arg0, %c0_i32, %c0_i32_0 : i32, i32, i32
  }
  func.func @transform_2(%arg0: i32) -> (i32, i32, i32) {
    %c0_i32 = arith.constant 0 : i32
    %c0_i32_0 = arith.constant 0 : i32
    %c0_i32_1 = arith.constant 0 : i32
    return %arg0, %c0_i32, %c0_i32_0 : i32, i32, i32
  }
  func.func @transform_3(%arg0: i32) -> (i32, i32, i32) {
    %c0_i32 = arith.constant 0 : i32
    %c0_i32_0 = arith.constant 0 : i32
    %c0_i32_1 = arith.constant 0 : i32
    return %arg0, %c0_i32, %c0_i32_0 : i32, i32, i32
  }
  func.func @transform_4(%arg0: i32) -> (i32, i32, i32) {
    %c0_i32 = arith.constant 0 : i32
    %c0_i32_0 = arith.constant 0 : i32
    %c0_i32_1 = arith.constant 0 : i32
    return %arg0, %c0_i32, %c0_i32_0 : i32, i32, i32
  }
  func.func @transform_5(%arg0: i32) -> (i32, i32, i32) {
    %c0_i32 = arith.constant 0 : i32
    %c0_i32_0 = arith.constant 0 : i32
    %c0_i32_1 = arith.constant 0 : i32
    return %arg0, %c0_i32, %c0_i32_0 : i32, i32, i32
  }
  func.func @transform_6(%arg0: i32) -> (i32, i32, i32) {
    %c0_i32 = arith.constant 0 : i32
    %c0_i32_0 = arith.constant 0 : i32
    %c0_i32_1 = arith.constant 0 : i32
    return %arg0, %c0_i32, %c0_i32_0 : i32, i32, i32
  }
  func.func @transform_7(%arg0: i32) -> (i32, i32, i32) {
    %c0_i32 = arith.constant 0 : i32
    %c0_i32_0 = arith.constant 0 : i32
    %c0_i32_1 = arith.constant 0 : i32
    return %arg0, %c0_i32, %c0_i32_0 : i32, i32, i32
  }
  func.func @transform_8(%arg0: i32) -> (i32, i32, i32) {
    %c0_i32 = arith.constant 0 : i32
    %c0_i32_0 = arith.constant 0 : i32
    %c0_i32_1 = arith.constant 0 : i32
    return %arg0, %c0_i32, %c0_i32_0 : i32, i32, i32
  }
  func.func @transform_9(%arg0: i32) -> (i32, i32, i32) {
    %c0_i32 = arith.constant 0 : i32
    %c0_i32_0 = arith.constant 0 : i32
    %c0_i32_1 = arith.constant 0 : i32
    return %arg0, %c0_i32, %c0_i32_0 : i32, i32, i32
  }
  func.func @transform_10(%arg0: i32) -> (i32, i32) {
    %c0_i32 = arith.constant 0 : i32
    %c0_i32_0 = arith.constant 0 : i32
    %c0_i32_1 = arith.constant 0 : i32
    return %c0_i32, %c0_i32_0 : i32, i32
  }
  func.func @transform_11(%arg0: i32) -> (i32, i32, i32) {
    %c0_i32 = arith.constant 0 : i32
    %c0_i32_0 = arith.constant 0 : i32
    %c0_i32_1 = arith.constant 0 : i32
    return %arg0, %c0_i32, %c0_i32_0 : i32, i32, i32
  }
}

</mosaic_0001>

<bundles_post_ra>
// kernel: tpu_custom_call.1
= control target key start
LH: loop header
LB: loop body
LE: loop exit
PB: predicated region body
PF: predicated region fallthrough
CT: control target
= control target key end

     0   :  { %16 = vsyncpa [#allocation3], 0  ;;  %s2446_s0 = inlined_call_operand.vmem [shape: f32[2,12,6], index: 0, kind: input, shape index: {}]   ;;  %s2447_s1 = inlined_call_operand.vmem [shape: f32[2,4,3], index: 1, kind: input, shape index: {}]   ;;  %s2448_s2 = inlined_call_operand.vmem [shape: f32[2,12,2], index: 2, kind: input, shape index: {}]   ;;  %s2449_s3 = inlined_call_operand.vmem [shape: f32[2,4,2], index: 3, kind: input, shape index: {}]   ;;  %s2450_s4 = inlined_call_operand.vmem [shape: bf16[2,24,12], index: 4, kind: input, shape index: {}]   ;;  %s2451_s5 = inlined_call_operand.vmem [shape: bf16[2,12,4], index: 5, kind: input, shape index: {}]   ;;  %s2452_s6 = inlined_call_operand.vmem [shape: bf16[2,4,12], index: 6, kind: input, shape index: {}]   ;;  %s2453_s7 = inlined_call_operand.vmem [shape: bf16[2,3,12], index: 7, kind: input, shape index: {}]   ;;  %s2454_s8 = inlined_call_operand.vmem [shape: f32[2,1,12], index: 8, kind: input, shape index: {}]   ;;  %s2455_s9 = inlined_call_operand.vmem [shape: f32[2,1,4], index: 9, kind: input, shape index: {}]   ;;  %s2456_s10 = inlined_call_operand.hbm [shape: f32[352,128], index: 10, kind: input, shape index: {}]   ;;  %s2457_s11 = inlined_call_operand.hbm [shape: f32[2,1,12], index: 11, kind: output, shape index: {}]  }
   0x1   :  { %17 = vsyncpa [#allocation4], 0  ;;  %s42_s19 = sshll.u32 %s2456_s10, 4  ;;  %s2063_s20 = smov [#allocation2]   ;;  %s43_s19 = int_to_ptr.hbm [resolvable:$true] %s42_s19 }
   0x2   :  { %s44_s21 = sshll.u32 %s2063_s20, 4  ;;  %s2064_s22 = smov 128   ;;  %s45_s21 = int_to_ptr.vmem [resolvable:$true] %s44_s21 }
   0x3   :  { %s2065_s23 = smov 8  }
   0x4   :  { %50 = dma.hbm_to_vmem [thread:$0]  %s43_s19, 5632, %s45_s21, [#allocation3], %s2064_s22, %s2064_s22, %s2065_s23  }
   0x5   :  { %2059 = dma.done.wait [#allocation3], 5632  }
   0x6   :  { %2060 = vsyncadd [#allocation3], 4294961664  ;;  %v2137_v0 = vld [vmem:[%s2446_s0] sm:$0xff]  ;;  %v2142_v1 = vld [vmem:[%s2446_s0 + $0x8] sm:$0xf]  ;;  %vm104_vm0 = vcmask 1045504  }
   0x7   :  { %v2147_v2 = vld [vmem:[%s2446_s0 + $0x10] sm:$0xff]  ;;  %v80_v3 = vpack.c.bf16 %v2137_v0, %v2137_v0  ;;  %v81_v4 = vpack.c.bf16 %v2142_v1, %v2142_v1  ;;  %v2156_v5 = vld [vmem:[%s2446_s0 + $0x18] sm:$0xf]  ;;  %vm97_vm1 = vcmask 97280   ;;  %v2168_v12 = vld [vmem:[%s2447_s1] sm:$0xf] }
   0x8   :  { %v82_v6 = vpack.c.bf16 %v2147_v2, %v2147_v2  ;;  %v83_v7 = vpack.c.bf16 %v2156_v5, %v2156_v5  ;;  %v73_v8 = vld [vmem:[%s2450_s4 + $0x14] sm:$0xf]  ;;  %vm177_vm2 = vcmask 1041408   ;;  %v166_v15 = vpack.c.bf16 %v2168_v12, %v2168_v12  ;;  %v2175_v16 = vld [vmem:[%s2447_s1 + $0x4] sm:$0xf]  ;;  %v2199_v28 = vld [vmem:[%s2450_s4 + $0xc] sm:$0xff] }
   0x9   :  { %v94_v9 = vunpack.c.l.b16 %v80_v3  ;;  %v95_v10 = vunpack.c.l.b16 %v81_v4  ;;  %v131_v14 = vunpack.c.l.b16 %v73_v8  ;;  %v1853_v17 = vld [vmem:[%s2451_s5 + $0x8] sm:$0xf]  ;;  %v1935_v18 = vld [vmem:[%s2451_s5 + $0x8] sm:$0x30]  ;;  %v167_v20 = vpack.c.bf16 %v2175_v16, %v2175_v16  ;;  %v2188_v22 = vld [vmem:[%s2450_s4] sm:$0xff]  ;;  %s1821_s29 = sshll.u32 %s2457_s11, 4  ;;  %s1822_s29 = int_to_ptr.hbm [resolvable:$true] %s1821_s29 }
   0xa   :  { %v136_v11 = vunpack.c.l.b16 %v82_v6  ;;  %v137_v13 = vunpack.c.l.b16 %v83_v7  ;;  %v179_v23 = vsel %vm177_vm2, %v166_v15, 0  ;;  %v2193_v26 = vor.u32 %v1935_v18, %v1853_v17  ;;  %v70_v30 = vld [vmem:[%s2450_s4 + $0x8] sm:$0xf]  ;;  %v1848_v32 = vld [vmem:[%s2451_s5] sm:$0xf]  ;;  %s2069_s30 = smov 16  }
   0xb   :  { %v96_v19 = vpack.c.b16 %v95_v10, %v94_v9  ;;  %v204_v25 = vsel %vm177_vm2, %v167_v20, 0  ;;  %v2201_v29 = vpack.c.b16 %v131_v14, %v131_v14  ;;  %vm173_vm3 = vcmask 31744   ;;  %v1934_v33 = vld [vmem:[%s2451_s5] sm:$0x30]  ;;  %v233_v36 = vld [vmem:[#allocation2 + $0x8] sm:$0x3f] }
   0xc   :  { %v138_v21 = vpack.c.b16 %v137_v13, %v136_v11  ;;  %213 = vmatpush.bf16.msra.mxu3 %v204_v25  ;;  %v89_v31 = vunpack.c.l.b16 %v70_v30  ;;  %v2222_v35 = vor.u32 %v1934_v33, %v1848_v32  ;;  %v226_v37 = vld [vmem:[#allocation2] sm:$0x3f]  ;;  %v351_v42 = vld [vmem:[#allocation2 + $0x10] sm:$0x3f]  ;;  %v224_v44 = vrot.slane %v2137_v0, 4  ;;  %v2250_v10 = vld [vmem:[%s2448_s2 + $0x10] sm:$0xff] }
   0xd   :  { %v106_v24 = vsel %vm104_vm0, %v96_v19, 0  ;;  %vm248_vm4 = vcmask 48128   ;;  %v225_v48 = vrot.slane %v2147_v2, 4  ;;  %v410_v54 = vld [vmem:[#allocation2 + $0x18] sm:$0x7]  ;;  %vm432_vm5 = vcmask 1042432  }
   0xe   :  { %115 = vmatpush.bf16.msra.mxu0 %v106_v24  ;;  %v146_v27 = vsel %vm104_vm0, %v138_v21, 0  ;;  %v2220_v34 = vpack.c.b16 %v89_v31, %v89_v31  ;;  %v471_v55 = vld [vmem:[#allocation2 + $0x20] sm:$0x3]  ;;  %v2255_v11 = vld [vmem:[%s2448_s2] sm:$0xff]  ;;  %v2260_v13 = vld [vmem:[%s2448_s2 + $0x18] sm:$0xf] }
   0xf   :  { %155 = vmatpush.bf16.msra.mxu1 %v146_v27  ;;  %1936 = vmatpush.bf16.msra.mxu2 %v146_v27  ;;  %v470_v14 = vrot.slane %v2250_v10, 4  ;;  %vm425_vm6 = vcmask 23552   ;;  %v469_v17 = vrot.slane %v2255_v11, 4  ;;  %v2268_v18 = vld [vmem:[%s2448_s2 + $0x8] sm:$0xf]  ;;  %vm486_vm7 = vcmask 15360  }
  0x10   :  { %1855 = vmatmul.msk.bf16.vlgmr.msra.gmra.mxu3 %vm173_vm3, %v2193_v26  ;;  %v534_v25 = vld [vmem:[#allocation2 + $0x38] sm:$0xff]  ;;  %v533_v30 = vld [vmem:[#allocation2 + $0x30] sm:$0xff]  ;;  %vm537_vm8 = vcmask 130048   ;;  %vm661_vm9 = vcmask 64512   ;;  %vm1314_vm10 = vcmask 1043456   ;;  %vm1370_vm11 = vcmask 60416  }
  0x11   :  { %1838 = vmatmul.msk.bf16.vlgmr.msra.gmra.mxu0 %vm97_vm1, %v2188_v22  ;;  %1937 = vmatpush.msk.msrb.mxu3 %vm104_vm0, %v233_v36  ;;  %vm1487_vm12 = vcmask 1041409   ;;  %vm1679_vm14 = vcmask 261120   ;;  %vm1763_vm15 = vcmask 257024   ;;  %s2070_s12 = smov 1  }
  0x12   :  { %1844 = vmatmul.msk.bf16.vlgmr.msra.gmra.mxu1 %vm97_vm1, %v2199_v28  ;;  %1845 = vmatmul.msk.bf16.vlgmr.msra.gmra.mxu2 %vm97_vm1, %v2201_v29 }
  0x13   :  { %188 = vmatpush.bf16.msrb.mxu2 %v179_v23  ;;  %1860 = vmatpush.msk.msra.mxu3 %vm104_vm0, %v226_v37 }
  0x14   :  { %1864 = vmatpush.msk.msrb.mxu0 %vm104_vm0, %v351_v42  ;;  %1868 = vmatpush.msk.msrb.mxu1 %vm432_vm5, %v410_v54  ;;  %v1949_v42 = vld [vmem:[#allocation2 + $0x28] ss:$0 sm:$0xff] }
  0x17   :  { %1856 = vmatpush.msk.msra.mxu2 %vm104_vm0, %v233_v36 }
  0x21   :  { %1839 = vmatmul.msk.bf16.gmra.mxu0 %vm97_vm1, %v2220_v34 }
  0x22   :  { %1850 = vmatmul.msk.bf16.vlgmr.msrb.gmra.mxu2 %vm173_vm3, %v2222_v35 }
  0x23   :  { %1872 = vmatpush.msk.msrb.mxu2 %vm177_vm2, %v471_v55 }
  0x8e   :  { %v117_v38 = vpop.f32.mrf.mxu0 }
  0x8f   :  { %v231_v39 = vrot.slane %v117_v38, 4  ;;  %234 = vst [vmem:[#allocation1] ss:$2 sm:$0xff] %v117_v38  ;;  %v157_v40 = vpop.f32.mrf.mxu1 }
  0x90   :  { %v232_v41 = vrot.slane %v157_v40, 4  ;;  %240 = vst [vmem:[#allocation1 + $0x11] ss:$2 sm:$0xff] %v157_v40 }
  0x91   :  { %236 = vst [vmem:[#allocation1 + $0x1] ss:$2 sm:$0xff] %v231_v39 }
  0x92   :  { %242 = vst [vmem:[#allocation1 + $0x20] ss:$2 sm:$0xff] %v232_v41 }
  0x93   :  { %v215_v61 = vpop.f32.mrf.mxu3 }
  0x94   :  { %v409_v3 = vrot.slane %v215_v61, 4 }
  0x95   :  { %v162_v43 = vpop.f32.mrf.mxu2 }
  0x96   :  { %v119_v45 = vpop.f32.mrf.mxu0  ;;  %344 = vst.sshfl [vmem:[#allocation1 + $0x30] sm:$0xff pattern:$0x75316420] %v162_v43 }
  0x97   :  { %238 = vst [vmem:[#allocation1 + $0x10] ss:$2 sm:$0xff] %v119_v45  ;;  %v159_v46 = vpop.f32.mrf.mxu1 }
  0x98   :  { %v245_v47 = vld.sshfl [vmem:[#allocation1] sm:$0xff pattern:$0x75316420]  ;;  %244 = vst [vmem:[#allocation1 + $0x21] ss:$2 sm:$0xff] %v159_v46 }
  0x99   :  { %284 = vst [vmem:[#allocation1] ss:$2 sm:$0xff] %v2137_v0  ;;  %1857 = vmatmul.msk.f32.vlgmr.msra.gmra.mxu2 %vm248_vm4, %v245_v47 }
  0x9a   :  { %286 = vst [vmem:[#allocation1 + $0x1] ss:$2 sm:$0xff] %v224_v44 }
  0x9b   :  { %v217_v4 = vpop.f32.mrf.mxu3 }
  0x9d   :  { %v164_v49 = vpop.f32.mrf.mxu2  ;;  %v348_v57 = vld [vmem:[#allocation1 + $0x30] ss:$2 sm:$0xff]  ;;  %v350_v62 = vld [vmem:[#allocation1 + $0x31] ss:$2 sm:$0xff] }
  0x9e   :  { %v122_v50 = vpop.f32.mrf.mxu0  ;;  %v246_v51 = vld.sshfl [vmem:[#allocation1 + $0x10] sm:$0xff pattern:$0x75316420] }
  0x9f   :  { %v247_v52 = vld.sshfl [vmem:[#allocation1 + $0x20] sm:$0xff pattern:$0x75316420]  ;;  %288 = vst [vmem:[#allocation1 + $0x10] ss:$2 sm:$0xff] %v2142_v1 }
  0xa0   :  { %1859 = vmatmul.msk.f32.vlgmr.msrb.gmra.mxu3 %vm248_vm4, %v247_v52  ;;  %292 = vst [vmem:[#allocation1 + $0x20] ss:$2 sm:$0xff] %v225_v48 }
  0xa1   :  { %294 = vst [vmem:[#allocation1 + $0x21] ss:$2 sm:$0xff] %v2156_v5  ;;  %1858 = vmatmul.msk.f32.gmra.mxu2 %vm248_vm4, %v246_v51  ;;  %v295_v53 = vld.sshfl [vmem:[#allocation1] sm:$0xff pattern:$0x75316420]  ;;  %561 = vmatpush.msrb.mxu3 %v534_v25 }
  0xa2   :  { %290 = vst [vmem:[#allocation1 + $0x11] ss:$2 sm:$0xff] %v2147_v2 }
  0xa3   :  { %335 = vst.sshfl [vmem:[#allocation1] sm:$0xff pattern:$0x75316420] %v119_v45  ;;  %562 = vmatpush.msrb.mxu3 %v533_v30 }
  0xa5   :  { %v190_v2 = vpop.f32.mrf.mxu2 }
  0xa6   :  { %v124_v56 = vpop.f32.mrf.mxu0  ;;  %v408_v5 = vrot.slane %v190_v2, 4 }
  0xa8   :  { %1861 = vmatmul.msk.f32.vlgmr.msra.gmra.mxu3 %vm248_vm4, %v295_v53  ;;  %v297_v58 = vld.sshfl [vmem:[#allocation1 + $0x20] sm:$0xff pattern:$0x75316420] }
  0xa9   :  { %v296_v59 = vld.sshfl [vmem:[#allocation1 + $0x10] sm:$0xff pattern:$0x75316420]  ;;  %343 = vst.sshfl [vmem:[#allocation1 + $0x20] sm:$0xff pattern:$0x75316420] %v159_v46 }
  0xaa   :  { %v338_v60 = vld [vmem:[#allocation1 + $0x1] ss:$2 sm:$0xff]  ;;  %336 = vst.sshfl [vmem:[#allocation1 + $0x10] sm:$0xff pattern:$0x75316420] %v122_v50 }
  0xab   :  { %352 = vst [vmem:[#allocation1] ss:$2 sm:$0xff] %v338_v60 }
  0xac   :  { %360 = vst [vmem:[#allocation1 + $0x20] ss:$2 sm:$0xff] %v348_v57 }
  0xad   :  { %v192_v9 = vpop.f32.mrf.mxu2 }
  0xb0   :  { %1862 = vmatmul.msk.f32.gmra.mxu3 %vm248_vm4, %v296_v59  ;;  %v346_v63 = vld [vmem:[#allocation1 + $0x21] ss:$2 sm:$0xff] }
  0xb1   :  { %v340_v0 = vld [vmem:[#allocation1 + $0x10] ss:$2 sm:$0xff]  ;;  %v342_v1 = vld [vmem:[#allocation1 + $0x11] ss:$2 sm:$0xff]  ;;  %362 = vst [vmem:[#allocation1 + $0x21] ss:$2 sm:$0xff] %v350_v62 }
  0xb2   :  { %356 = vst [vmem:[#allocation1 + $0x10] ss:$2 sm:$0xff] %v342_v1 }
  0xb3   :  { %354 = vst [vmem:[#allocation1 + $0x1] ss:$2 sm:$0xff] %v340_v0 }
  0xb4   :  { %358 = vst [vmem:[#allocation1 + $0x11] ss:$2 sm:$0xff] %v346_v63 }
  0xb8   :  { %1863 = vmatmul.msk.f32.gmra.mxu3 %vm248_vm4, %v297_v58  ;;  %v365_v6 = vld.sshfl [vmem:[#allocation1 + $0x20] sm:$0xff pattern:$0x75316420] }
  0xb9   :  { %419 = vst [vmem:[#allocation1 + $0x20] ss:$2 sm:$0xff] %v409_v3 }
  0xba   :  { %v363_v7 = vld.sshfl [vmem:[#allocation1] sm:$0xff pattern:$0x75316420]  ;;  %421 = vst [vmem:[#allocation1 + $0x21] ss:$2 sm:$0xff] %v217_v4 }
  0xbb   :  { %1865 = vmatmul.msk.f32.vlgmr.msrb.gmra.mxu0 %vm248_vm4, %v363_v7  ;;  %411 = vst [vmem:[#allocation1] ss:$2 sm:$0xff] %v190_v2  ;;  %v364_v8 = vld.sshfl [vmem:[#allocation1 + $0x10] sm:$0xff pattern:$0x75316420] }
  0xbc   :  { %413 = vst [vmem:[#allocation1 + $0x1] ss:$2 sm:$0xff] %v408_v5  ;;  %v1950_v2 = vld [vmem:[#allocation2 + $0x40] ss:$0 sm:$0xff]  ;;  %v654_v5 = vld [vmem:[#allocation2 + $0x50] sm:$0xff] }
  0xbd   :  { %415 = vst [vmem:[#allocation1 + $0x10] ss:$2 sm:$0xff] %v192_v9  ;;  %679 = vmatpush.msra.mxu2 %v654_v5 }
  0xbe   :  { %417 = vst [vmem:[#allocation1 + $0x11] ss:$2 sm:$0xff] %v215_v61 }
  0xc1   :  { %v424_v15 = vld.sshfl [vmem:[#allocation1 + $0x20] sm:$0xff pattern:$0x75316420] }
  0xc2   :  { %482 = vst [vmem:[#allocation1 + $0x21] ss:$2 sm:$0xff] %v2260_v13 }
  0xc3   :  { %1866 = vmatmul.msk.f32.gmra.mxu0 %vm248_vm4, %v364_v8  ;;  %v422_v19 = vld.sshfl [vmem:[#allocation1] sm:$0xff pattern:$0x75316420]  ;;  %480 = vst [vmem:[#allocation1 + $0x20] ss:$2 sm:$0xff] %v470_v14 }
  0xc4   :  { %1869 = vmatmul.msk.f32.vlgmr.msrb.gmra.mxu1 %vm425_vm6, %v422_v19  ;;  %472 = vst [vmem:[#allocation1] ss:$2 sm:$0xff] %v2255_v11 }
  0xc5   :  { %v423_v20 = vld.sshfl [vmem:[#allocation1 + $0x10] sm:$0xff pattern:$0x75316420]  ;;  %474 = vst [vmem:[#allocation1 + $0x1] ss:$2 sm:$0xff] %v469_v17 }
  0xc6   :  { %476 = vst [vmem:[#allocation1 + $0x10] ss:$2 sm:$0xff] %v2268_v18 }
  0xc7   :  { %478 = vst [vmem:[#allocation1 + $0x11] ss:$2 sm:$0xff] %v2250_v10 }
  0xca   :  { %v485_v24 = vld.sshfl [vmem:[#allocation1 + $0x20] sm:$0xff pattern:$0x75316420] }
  0xcb   :  { %1867 = vmatmul.msk.f32.gmra.mxu0 %vm248_vm4, %v365_v6 }
  0xcc   :  { %1870 = vmatmul.msk.f32.gmra.mxu1 %vm425_vm6, %v423_v20  ;;  %v483_v21 = vld.sshfl [vmem:[#allocation1] sm:$0xff pattern:$0x75316420] }
  0xcd   :  { %1873 = vmatmul.msk.f32.vlgmr.msrb.gmra.mxu2 %vm486_vm7, %v483_v21 }
  0xce   :  { %v484_v23 = vld.sshfl [vmem:[#allocation1 + $0x10] sm:$0xff pattern:$0x75316420] }
  0xd4   :  { %1871 = vmatmul.msk.f32.gmra.mxu1 %vm425_vm6, %v424_v15 }
  0xd5   :  { %1874 = vmatmul.msk.f32.gmra.mxu2 %vm486_vm7, %v484_v23 }
  0xdd   :  { %1875 = vmatmul.msk.f32.gmra.mxu2 %vm486_vm7, %v485_v24 }
 0x11c   :  { %v275_v31 = vpop.f32.mrf.mxu2 }
 0x123   :  { %v281_v27 = vpop.f32.mrf.mxu3 }
 0x124   :  { %v278_v36 = vpop.f32.mrf.mxu2 }
 0x12b   :  { %v324_v32 = vpop.f32.mrf.mxu3 }
 0x12c   :  { %v325_v38 = vadd.f32 %v324_v32, %v275_v31 }
 0x133   :  { %v327_v40 = vpop.f32.mrf.mxu3 }
 0x134   :  { %v328_v47 = vadd.f32 %v327_v40, %v278_v36 }
 0x138   :  { %v392_v33 = vpop.f32.mrf.mxu0 }
 0x139   :  { %v401_v39 = vadd.f32 %v392_v33, %v325_v38  ;;  %v2304_v38 = vld [vmem:[%s2452_s6] sm:$0x3] }
 0x13b   :  { %v330_v51 = vpop.f32.mrf.mxu3 }
 0x13c   :  { %v331_v56 = vadd.f32 %v330_v51, %v281_v27 }
 0x140   :  { %v395_v43 = vpop.f32.mrf.mxu0 }
 0x141   :  { %v453_v37 = vpop.f32.mrf.mxu1  ;;  %v402_v49 = vadd.f32 %v395_v43, %v328_v47  ;;  %v2312_v47 = vld [vmem:[%s2452_s6 + $0x2] sm:$0x3] }
 0x142   :  { %v462_v41 = vadd.f32 %v453_v37, %v401_v39 }
 0x148   :  { %v398_v54 = vpop.f32.mrf.mxu0 }
 0x149   :  { %v456_v46 = vpop.f32.mrf.mxu1  ;;  %v403_v59 = vadd.f32 %v398_v54, %v331_v56 }
 0x14a   :  { %v463_v50 = vadd.f32 %v456_v46, %v402_v49  ;;  %v715_v49 = vld [vmem:[#allocation2 + $0x58] sm:$0x3] }
 0x150   :  { %v513_v44 = vpop.f32.mrf.mxu2 }
 0x151   :  { %v522_v45 = vadd.f32 %v513_v44, %v462_v41  ;;  %v459_v58 = vpop.f32.mrf.mxu1 }
 0x152   :  { %v464_v60 = vadd.f32 %v459_v58, %v403_v59 }
 0x153   :  { %v527_v48 = vadd.f32 %v1949_v42, %v522_v45 }
 0x155   :  { %1961 = vtanh.f32 %v527_v48  ;;  %v653_v48 = vld [vmem:[#allocation2 + $0x48] sm:$0x7] }
 0x156   :  { %1882 = vmatpush.msk.msra.mxu3 %vm432_vm5, %v653_v48 }
 0x158   :  { %v516_v52 = vpop.f32.mrf.mxu2 }
 0x159   :  { %v523_v53 = vadd.f32 %v516_v52, %v463_v50 }
 0x15b   :  { %v1962_v55 = vpop.eup %1961  ;;  %v528_v57 = vadd.f32 %v1949_v42, %v523_v53 }
 0x15c   :  { %1876 = vmatmul.msk.f32.vlgmr.msrb.gmra.mxu3 %vm537_vm8, %v1962_v55 }
 0x15d   :  { %1963 = vtanh.f32 %v528_v57 }
 0x160   :  { %v519_v61 = vpop.f32.mrf.mxu2 }
 0x161   :  { %v524_v62 = vadd.f32 %v519_v61, %v464_v60 }
 0x163   :  { %v1964_v63 = vpop.eup %1963  ;;  %v529_v0 = vadd.f32 %v1949_v42, %v524_v62  ;;  %v931_v62 = vld [vmem:[#allocation2 + $0x78] sm:$0xff] }
 0x164   :  { %1877 = vmatmul.msk.f32.gmra.mxu3 %vm537_vm8, %v1964_v63 }
 0x165   :  { %1965 = vtanh.f32 %v529_v0 }
 0x16b   :  { %v1966_v1 = vpop.eup %1965 }
 0x16c   :  { %1878 = vmatmul.msk.f32.gmra.mxu3 %vm537_vm8, %v1966_v1 }
 0x1df   :  { %v564_v3 = vpop.f32.mrf.mxu3 }
 0x1e0   :  { %v565_v4 = vadd.f32 %v1950_v2, %v564_v3 }
 0x1e2   :  { %1967 = vtanh.f32 %v565_v4 }
 0x1e7   :  { %v567_v6 = vpop.f32.mrf.mxu3 }
 0x1e8   :  { %v2288_v7 = vpop.eup %1967  ;;  %v568_v8 = vadd.f32 %v1950_v2, %v567_v6 }
 0x1e9   :  { %v579_v9 = vrot.slane %v2288_v7, 4  ;;  %582 = vst [vmem:[#allocation1] ss:$2 sm:$0xff] %v2288_v7 }
 0x1ea   :  { %1969 = vtanh.f32 %v568_v8 }
 0x1eb   :  { %584 = vst [vmem:[#allocation1 + $0x1] ss:$2 sm:$0xff] %v579_v9 }
 0x1ef   :  { %v570_v15 = vpop.f32.mrf.mxu3 }
 0x1f0   :  { %v2292_v19 = vpop.eup %1969  ;;  %v571_v20 = vadd.f32 %v1950_v2, %v570_v15  ;;  %v1951_v2 = vld [vmem:[#allocation2 + $0x60] ss:$0 sm:$0xff] }
 0x1f1   :  { %v580_v21 = vrot.slane %v2292_v19, 4  ;;  %586 = vst [vmem:[#allocation1 + $0x10] ss:$2 sm:$0xff] %v2292_v19 }
 0x1f2   :  { %1971 = vtanh.f32 %v571_v20  ;;  %v587_v23 = vld.sshfl [vmem:[#allocation1] sm:$0xff pattern:$0x75316420] }
 0x1f3   :  { %590 = vst [vmem:[#allocation1 + $0x20] ss:$2 sm:$0xff] %v580_v21  ;;  %v601_v24 = vpack.c.bf16 %v587_v23, %v587_v23 }
 0x1f5   :  { %v607_v32 = vunpack.c.l.b16 %v601_v24 }
 0x1f8   :  { %v2296_v25 = vpop.eup %1971  ;;  %v588_v27 = vld.sshfl [vmem:[#allocation1 + $0x10] sm:$0xff pattern:$0x75316420] }
 0x1f9   :  { %v581_v30 = vrot.slane %v2296_v25, 4  ;;  %592 = vst [vmem:[#allocation1 + $0x21] ss:$2 sm:$0xff] %v2296_v25  ;;  %v602_v31 = vpack.c.bf16 %v588_v27, %v588_v27 }
 0x1fb   :  { %594 = vst [vmem:[#allocation1 + $0x30] ss:$2 sm:$0xff] %v581_v30  ;;  %v608_v33 = vunpack.c.l.b16 %v602_v31  ;;  %v834_v30 = vld [vmem:[#allocation2 + $0x70] sm:$0xff] }
 0x1fd   :  { %v609_v36 = vpack.c.b16 %v608_v33, %v607_v32  ;;  %v827_v33 = vld [vmem:[#allocation2 + $0x68] sm:$0xff] }
 0x1ff   :  { %v614_v37 = vsel %vm104_vm0, %v609_v36, 0 }
 0x200   :  { %623 = vmatpush.bf16.msra.mxu0 %v614_v37  ;;  %v595_v39 = vld.sshfl [vmem:[#allocation1 + $0x20] sm:$0xff pattern:$0x75316420] }
 0x201   :  { %v603_v40 = vpack.c.bf16 %v595_v39, %v595_v39 }
 0x202   :  { %v596_v41 = vld.sshfl [vmem:[#allocation1 + $0x30] sm:$0xff pattern:$0x75316420] }
 0x203   :  { %1879 = vmatmul.msk.bf16.vlgmr.msra.gmra.mxu0 %vm97_vm1, %v2304_v38  ;;  %v604_v42 = vpack.c.bf16 %v596_v41, %v596_v41  ;;  %v631_v43 = vunpack.c.l.b16 %v603_v40 }
 0x204   :  { %1884 = vmatpush.msk.msrb.mxu0 %vm177_vm2, %v715_v49 }
 0x205   :  { %v632_v44 = vunpack.c.l.b16 %v604_v42 }
 0x207   :  { %v633_v45 = vpack.c.b16 %v632_v44, %v631_v43  ;;  %v1037_v44 = vld [vmem:[#allocation2 + $0x88] sm:$0x3] }
 0x209   :  { %v638_v46 = vsel %vm104_vm0, %v633_v45, 0 }
 0x20a   :  { %647 = vmatpush.bf16.msra.mxu1 %v638_v46  ;;  %780 = vmatpush.bf16.msrb.mxu2 %v638_v46 }
 0x20d   :  { %1880 = vmatmul.msk.bf16.vlgmr.msra.gmra.mxu1 %vm97_vm1, %v2312_v47 }
 0x20e   :  { %762 = vmatpush.bf16.msrb.mxu1 %v614_v37 }
 0x212   :  { %967 = vmatpush.msra.mxu1 %v931_v62 }
 0x21d   :  { %1886 = vmatmul.msk.bf16.vlgmr.msrb.gmra.mxu1 %vm97_vm1, %v2188_v22  ;;  %v2328_v22 = vld [vmem:[%s2449_s3] sm:$0xf] }
 0x22d   :  { %1887 = vmatmul.msk.bf16.gmra.mxu1 %vm97_vm1, %v2220_v34  ;;  %v2333_v34 = vld [vmem:[%s2449_s3 + $0x4] sm:$0xf] }
 0x280   :  { %v625_v50 = vpop.f32.mrf.mxu0 }
 0x281   :  { %657 = vst [vmem:[#allocation1] ss:$2 sm:$0xff] %v625_v50 }
 0x288   :  { %v627_v51 = vpop.f32.mrf.mxu0 }
 0x28a   :  { %v649_v52 = vpop.f32.mrf.mxu1 }
 0x28b   :  { %659 = vst [vmem:[#allocation1 + $0x1] ss:$2 sm:$0xff] %v649_v52 }
 0x292   :  { %v651_v53 = vpop.f32.mrf.mxu1  ;;  %v660_v54 = vld.sshfl [vmem:[#allocation1] sm:$0xff pattern:$0x75316420] }
 0x293   :  { %1881 = vmatmul.msk.f32.vlgmr.msra.gmra.mxu2 %vm661_vm9, %v660_v54  ;;  %686 = vst [vmem:[#allocation1] ss:$2 sm:$0xff] %v2168_v12 }
 0x294   :  { %688 = vst [vmem:[#allocation1 + $0x1] ss:$2 sm:$0xff] %v2175_v16 }
 0x29a   :  { %v764_v16 = vpop.f32.mrf.mxu1 }
 0x29b   :  { %v689_v55 = vld.sshfl [vmem:[#allocation1] sm:$0xff pattern:$0x75316420]  ;;  %1888 = vmatmul.msk.bf16.vlgmr.msrb.gmra.mxu2 %vm97_vm1, %v2199_v28  ;;  %v832_v56 = vrot.slane %v764_v16, 4 }
 0x29c   :  { %1883 = vmatmul.msk.f32.vlgmr.msra.gmra.mxu3 %vm425_vm6, %v689_v55  ;;  %718 = vst [vmem:[#allocation1] ss:$2 sm:$0xff] %v2328_v22 }
 0x29d   :  { %720 = vst [vmem:[#allocation1 + $0x1] ss:$2 sm:$0xff] %v2333_v34 }
 0x2a2   :  { %v766_v58 = vpop.f32.mrf.mxu1 }
 0x2a3   :  { %839 = vst [vmem:[#allocation1 + $0x10] ss:$2 sm:$0xff] %v766_v58 }
 0x2a4   :  { %v721_v12 = vld.sshfl [vmem:[#allocation1] sm:$0xff pattern:$0x75316420] }
 0x2a5   :  { %1885 = vmatmul.msk.f32.vlgmr.msrb.gmra.mxu0 %vm486_vm7, %v721_v12  ;;  %835 = vst [vmem:[#allocation1] ss:$2 sm:$0xff] %v764_v16 }
 0x2a6   :  { %837 = vst [vmem:[#allocation1 + $0x1] ss:$2 sm:$0xff] %v832_v56  ;;  %v1211_v56 = vld [vmem:[#allocation2 + $0xb0] sm:$0xff] }
 0x2aa   :  { %v769_v28 = vpop.f32.mrf.mxu1 }
 0x2ab   :  { %1889 = vmatmul.msk.bf16.gmra.mxu2 %vm97_vm1, %v2201_v29 }
 0x2ad   :  { %v846_v57 = vld.sshfl [vmem:[#allocation1] sm:$0xff pattern:$0x75316420] }
 0x2ae   :  { %915 = vst.sshfl [vmem:[#allocation1] sm:$0xff pattern:$0x75316420] %v766_v58 }
 0x2b2   :  { %v771_v60 = vpop.f32.mrf.mxu1 }
 0x2b5   :  { %v918_v59 = vld [vmem:[#allocation1 + $0x1] ss:$2 sm:$0xff] }
 0x2b6   :  { %932 = vst [vmem:[#allocation1] ss:$2 sm:$0xff] %v918_v59  ;;  %v1952_v59 = vld [vmem:[#allocation2 + $0x90] ss:$0 sm:$0xff] }
 0x316   :  { %v681_v61 = vpop.f32.mrf.mxu2 }
 0x31e   :  { %v782_v63 = vpop.f32.mrf.mxu2 }
 0x31f   :  { %v712_v0 = vpop.f32.mrf.mxu3  ;;  %v833_v1 = vrot.slane %v782_v63, 4  ;;  %841 = vst [vmem:[#allocation1 + $0x11] ss:$2 sm:$0xff] %v782_v63 }
 0x320   :  { %v713_v29 = vadd.f32 %v712_v0, %v681_v61 }
 0x321   :  { %843 = vst [vmem:[#allocation1 + $0x20] ss:$2 sm:$0xff] %v833_v1 }
 0x322   :  { %v744_v3 = vpop.f32.mrf.mxu0 }
 0x323   :  { %v747_v4 = vadd.f32 %v744_v3, %v713_v29 }
 0x325   :  { %v750_v5 = vadd.f32 %v1951_v2, %v747_v4 }
 0x326   :  { %v847_v6 = vld.sshfl [vmem:[#allocation1 + $0x10] sm:$0xff pattern:$0x75316420]  ;;  %v784_v8 = vpop.f32.mrf.mxu2 }
 0x327   :  { %1973 = vtanh.f32 %v750_v5  ;;  %916 = vst.sshfl [vmem:[#allocation1 + $0x10] sm:$0xff pattern:$0x75316420] %v769_v28 }
 0x328   :  { %845 = vst [vmem:[#allocation1 + $0x21] ss:$2 sm:$0xff] %v784_v8 }
 0x32d   :  { %v2343_v9 = vpop.eup %1973 }
 0x32e   :  { %v920_v15 = vld [vmem:[#allocation1 + $0x10] ss:$2 sm:$0xff]  ;;  %v922_v20 = vld [vmem:[#allocation1 + $0x11] ss:$2 sm:$0xff]  ;;  %v787_v21 = vpop.f32.mrf.mxu2  ;;  %v791_v23 = vpack.c.bf16 %v2343_v9, %v2343_v9  ;;  %v753_v24 = vrot.slane %v2343_v9, 4 }
 0x32f   :  { %934 = vst [vmem:[#allocation1 + $0x1] ss:$2 sm:$0xff] %v920_v15  ;;  %v848_v27 = vld.sshfl [vmem:[#allocation1 + $0x20] sm:$0xff pattern:$0x75316420] }
 0x330   :  { %936 = vst [vmem:[#allocation1 + $0x10] ss:$2 sm:$0xff] %v922_v20  ;;  %v794_v31 = vsel %vm177_vm2, %v791_v23, 0  ;;  %v792_v32 = vpack.c.bf16 %v753_v24, %v753_v24 }
 0x331   :  { %923 = vst.sshfl [vmem:[#allocation1 + $0x20] sm:$0xff pattern:$0x75316420] %v784_v8  ;;  %803 = vmatpush.bf16.msrb.mxu3 %v794_v31 }
 0x332   :  { %924 = vst.sshfl [vmem:[#allocation1 + $0x30] sm:$0xff pattern:$0x75316420] %v787_v21  ;;  %v811_v36 = vsel %vm177_vm2, %v792_v32, 0 }
 0x333   :  { %820 = vmatpush.bf16.msra.mxu0 %v811_v36  ;;  %v1953_v36 = vld [vmem:[#allocation2 + $0xa8] ss:$0 sm:$0xff] }
 0x334   :  { %1890 = vmatmul.msk.bf16.vlgmr.msrb.gmra.mxu3 %vm173_vm3, %v2222_v35 }
 0x335   :  { %870 = vmatpush.msra.mxu3 %v834_v30 }
 0x336   :  { %v943_v37 = vld.sshfl [vmem:[#allocation1] sm:$0xff pattern:$0x75316420]  ;;  %1891 = vmatmul.msk.bf16.vlgmr.msra.gmra.mxu0 %vm173_vm3, %v2193_v26  ;;  %v789_v39 = vpop.f32.mrf.mxu2  ;;  %v987_v26 = vld [vmem:[#allocation2 + $0x80] sm:$0xff] }
 0x337   :  { %902 = vmatpush.msrb.mxu0 %v827_v33  ;;  %1898 = vmatmul.msk.f32.vlgmr.msra.gmra.mxu1 %vm661_vm9, %v943_v37 }
 0x338   :  { %v926_v40 = vld [vmem:[#allocation1 + $0x21] ss:$2 sm:$0xff]  ;;  %1023 = vmatpush.msra.mxu2 %v987_v26  ;;  %1904 = vmatpush.msk.msrb.mxu3 %vm177_vm2, %v1037_v44  ;;  %v1396_v26 = vld [vmem:[#allocation2 + $0xd0] sm:$0xf] }
 0x339   :  { %938 = vst [vmem:[#allocation1 + $0x11] ss:$2 sm:$0xff] %v926_v40  ;;  %v928_v41 = vld [vmem:[#allocation1 + $0x30] ss:$2 sm:$0xff]  ;;  %v930_v42 = vld [vmem:[#allocation1 + $0x31] ss:$2 sm:$0xff] }
 0x33a   :  { %940 = vst [vmem:[#allocation1 + $0x20] ss:$2 sm:$0xff] %v928_v41  ;;  %v1212_v40 = vld [vmem:[#allocation2 + $0xb8] sm:$0xff] }
 0x33b   :  { %942 = vst [vmem:[#allocation1 + $0x21] ss:$2 sm:$0xff] %v930_v42 }
 0x340   :  { %v944_v43 = vld.sshfl [vmem:[#allocation1 + $0x10] sm:$0xff pattern:$0x75316420] }
 0x341   :  { %1899 = vmatmul.msk.f32.gmra.mxu1 %vm661_vm9, %v944_v43 }
 0x342   :  { %v945_v35 = vld.sshfl [vmem:[#allocation1 + $0x20] sm:$0xff pattern:$0x75316420] }
 0x344   :  { %1892 = vmatmul.msk.f32.vlgmr.msra.gmra.mxu3 %vm661_vm9, %v846_v57 }
 0x345   :  { %1236 = vmatpush.msra.mxu3 %v1212_v40 }
 0x346   :  { %1895 = vmatmul.msk.f32.vlgmr.msrb.gmra.mxu0 %vm661_vm9, %v2288_v7 }
 0x349   :  { %1900 = vmatmul.msk.f32.gmra.mxu1 %vm661_vm9, %v945_v35 }
 0x34c   :  { %1893 = vmatmul.msk.f32.gmra.mxu3 %vm661_vm9, %v847_v6 }
 0x34e   :  { %1896 = vmatmul.msk.f32.gmra.mxu0 %vm661_vm9, %v2292_v19 }
 0x354   :  { %1894 = vmatmul.msk.f32.gmra.mxu3 %vm661_vm9, %v848_v27 }
 0x356   :  { %1897 = vmatmul.msk.f32.gmra.mxu0 %vm661_vm9, %v2296_v25 }
 0x3b3   :  { %v822_v45 = vpop.f32.mrf.mxu0 }
 0x3b4   :  { %v986_v7 = vrot.slane %v822_v45, 4  ;;  %994 = vst [vmem:[#allocation1 + $0x11] ss:$2 sm:$0xff] %v822_v45  ;;  %v969_v54 = vpop.f32.mrf.mxu1 }
 0x3b6   :  { %996 = vst [vmem:[#allocation1 + $0x20] ss:$2 sm:$0xff] %v986_v7 }
 0x3b7   :  { %v805_v46 = vpop.f32.mrf.mxu3 }
 0x3b8   :  { %v985_v48 = vrot.slane %v805_v46, 4  ;;  %988 = vst [vmem:[#allocation1] ss:$2 sm:$0xff] %v805_v46 }
 0x3ba   :  { %990 = vst [vmem:[#allocation1 + $0x1] ss:$2 sm:$0xff] %v985_v48 }
 0x3bb   :  { %v824_v49 = vpop.f32.mrf.mxu0 }
 0x3bc   :  { %998 = vst [vmem:[#allocation1 + $0x21] ss:$2 sm:$0xff] %v824_v49 }
 0x3be   :  { %v972_v63 = vpop.f32.mrf.mxu1 }
 0x3bf   :  { %v807_v19 = vpop.f32.mrf.mxu3 }
 0x3c0   :  { %992 = vst [vmem:[#allocation1 + $0x10] ss:$2 sm:$0xff] %v807_v19 }
 0x3c1   :  { %v999_v50 = vld.sshfl [vmem:[#allocation1] sm:$0xff pattern:$0x75316420] }
 0x3c2   :  { %1038 = vst [vmem:[#allocation1] ss:$2 sm:$0xff] %v2255_v11  ;;  %1901 = vmatmul.msk.f32.vlgmr.msra.gmra.mxu2 %vm661_vm9, %v999_v50 }
 0x3c3   :  { %1040 = vst [vmem:[#allocation1 + $0x1] ss:$2 sm:$0xff] %v469_v17  ;;  %v1001_v25 = vld.sshfl [vmem:[#allocation1 + $0x20] sm:$0xff pattern:$0x75316420] }
 0x3c4   :  { %1048 = vst [vmem:[#allocation1 + $0x21] ss:$2 sm:$0xff] %v2260_v13  ;;  %v1098_v17 = vld [vmem:[#allocation2 + $0x98] sm:$0xff] }
 0x3c5   :  { %1046 = vst [vmem:[#allocation1 + $0x20] ss:$2 sm:$0xff] %v470_v14  ;;  %v1099_v14 = vld [vmem:[#allocation2 + $0xa0] sm:$0xff] }
 0x3c6   :  { %1125 = vmatpush.msra.mxu0 %v1099_v14  ;;  %v975_v20 = vpop.f32.mrf.mxu1 }
 0x3c7   :  { %v1000_v51 = vld.sshfl [vmem:[#allocation1 + $0x10] sm:$0xff pattern:$0x75316420]  ;;  %v872_v13 = vpop.f32.mrf.mxu3 }
 0x3c8   :  { %1042 = vst [vmem:[#allocation1 + $0x10] ss:$2 sm:$0xff] %v2268_v18  ;;  %1126 = vmatpush.msra.mxu0 %v1098_v17 }
 0x3c9   :  { %1044 = vst [vmem:[#allocation1 + $0x11] ss:$2 sm:$0xff] %v2250_v10  ;;  %v904_v10 = vpop.f32.mrf.mxu0 }
 0x3ca   :  { %v1049_v52 = vld.sshfl [vmem:[#allocation1] sm:$0xff pattern:$0x75316420]  ;;  %1902 = vmatmul.msk.f32.gmra.mxu2 %vm661_vm9, %v1000_v51  ;;  %v905_v16 = vadd.f32 %v904_v10, %v872_v13  ;;  %1258 = vmatpush.msrb.mxu0 %v1211_v56 }
 0x3cb   :  { %1905 = vmatmul.msk.f32.vlgmr.msrb.gmra.mxu3 %vm486_vm7, %v1049_v52 }
 0x3cc   :  { %v1051_v11 = vld.sshfl [vmem:[#allocation1 + $0x20] sm:$0xff pattern:$0x75316420]  ;;  %v978_v57 = vadd.f32 %v969_v54, %v905_v16 }
 0x3cf   :  { %v875_v18 = vpop.f32.mrf.mxu3 }
 0x3d0   :  { %v1050_v53 = vld.sshfl [vmem:[#allocation1 + $0x10] sm:$0xff pattern:$0x75316420] }
 0x3d1   :  { %v907_v58 = vpop.f32.mrf.mxu0 }
 0x3d2   :  { %1903 = vmatmul.msk.f32.gmra.mxu2 %vm661_vm9, %v1001_v25  ;;  %v908_v61 = vadd.f32 %v907_v58, %v875_v18  ;;  %v1263_v58 = vld [vmem:[#allocation2 + $0xc0] sm:$0x3] }
 0x3d3   :  { %1906 = vmatmul.msk.f32.gmra.mxu3 %vm486_vm7, %v1050_v53 }
 0x3d4   :  { %v979_v29 = vadd.f32 %v972_v63, %v908_v61 }
 0x3d7   :  { %v878_v55 = vpop.f32.mrf.mxu3 }
 0x3d9   :  { %v910_v3 = vpop.f32.mrf.mxu0 }
 0x3da   :  { %v911_v5 = vadd.f32 %v910_v3, %v878_v55  ;;  %v1431_v3 = vld [vmem:[#allocation2 + $0xe0] sm:$0xff] }
 0x3db   :  { %1907 = vmatmul.msk.f32.gmra.mxu3 %vm486_vm7, %v1051_v11 }
 0x3dc   :  { %v980_v23 = vadd.f32 %v975_v20, %v911_v5  ;;  %v1482_v5 = vld [vmem:[%s2453_s7] sm:$0x3] }
 0x445   :  { %v1025_v12 = vpop.f32.mrf.mxu2 }
 0x446   :  { %v1034_v28 = vadd.f32 %v1025_v12, %v978_v57 }
 0x44d   :  { %v1028_v0 = vpop.f32.mrf.mxu2 }
 0x44e   :  { %v1078_v60 = vpop.f32.mrf.mxu3  ;;  %v1035_v2 = vadd.f32 %v1028_v0, %v979_v29  ;;  %v1302_v0 = vld [vmem:[%s2454_s8 + $0x1] sm:$0x1]  ;;  %v1432_v29 = vld [vmem:[#allocation2 + $0xe8] sm:$0xff] }
 0x44f   :  { %v1087_v62 = vadd.f32 %v1078_v60, %v1034_v28 }
 0x451   :  { %v1092_v1 = vadd.f32 %v1952_v59, %v1087_v62  ;;  %v1394_v62 = vld [vmem:[%s2455_s9] sm:$0x1] }
 0x453   :  { %1975 = vtanh.f32 %v1092_v1  ;;  %v1301_v1 = vld [vmem:[%s2454_s8] sm:$0x1] }
 0x455   :  { %v1031_v21 = vpop.f32.mrf.mxu2 }
 0x456   :  { %v1081_v4 = vpop.f32.mrf.mxu3  ;;  %v1036_v24 = vadd.f32 %v1031_v21, %v980_v23 }
 0x457   :  { %v1088_v6 = vadd.f32 %v1081_v4, %v1035_v2  ;;  %v1459_v2 = vld [vmem:[#allocation2 + $0x100] sm:$0xff]  ;;  %v1458_v4 = vld [vmem:[#allocation2 + $0xf8] sm:$0xff] }
 0x459   :  { %v1976_v8 = vpop.eup %1975  ;;  %v1093_v15 = vadd.f32 %v1952_v59, %v1088_v6  ;;  %v1483_v6 = vld [vmem:[%s2453_s7 + $0x2] sm:$0x3]  ;;  %s2068_s7 = smov [#allocation5]  }
 0x45a   :  { %1908 = vmatmul.msk.f32.vlgmr.msra.gmra.mxu0 %vm537_vm8, %v1976_v8  ;;  %s1819_s8 = sshll.u32 %s2068_s7, 4  ;;  %s1820_s8 = int_to_ptr.vmem [resolvable:$true] %s1819_s8 }
 0x45b   :  { %1977 = vtanh.f32 %v1093_v15  ;;  %1921 = vmatpush.msk.msra.mxu0 %vm1314_vm10, %v1396_v26  ;;  %v1955_v15 = vld [vmem:[#allocation2 + $0xd8] ss:$0 sm:$0xff]  ;;  %v2066_v26 = vmov 4.0  }
 0x45e   :  { %v1084_v27 = vpop.f32.mrf.mxu3 }
 0x45f   :  { %v1089_v30 = vadd.f32 %v1084_v27, %v1036_v24 }
 0x461   :  { %v1978_v31 = vpop.eup %1977  ;;  %v1094_v32 = vadd.f32 %v1952_v59, %v1089_v30 }
 0x462   :  { %1909 = vmatmul.msk.f32.gmra.mxu0 %vm537_vm8, %v1978_v31 }
 0x463   :  { %1979 = vtanh.f32 %v1094_v32  ;;  %v1954_v32 = vld [vmem:[#allocation2 + $0xc8] ss:$0 sm:$0xff] }
 0x469   :  { %v1980_v33 = vpop.eup %1979 }
 0x46a   :  { %1910 = vmatmul.msk.f32.gmra.mxu0 %vm537_vm8, %v1980_v33 }
 0x472   :  { %1914 = vmatmul.msk.f32.vlgmr.msrb.gmra.mxu0 %vm661_vm9, %v2343_v9 }
 0x4d7   :  { %v1128_v37 = vpop.f32.mrf.mxu0 }
 0x4d8   :  { %v1129_v39 = vadd.f32 %v1953_v36, %v1128_v37 }
 0x4da   :  { %1981 = vtanh.f32 %v1129_v39 }
 0x4df   :  { %v1131_v41 = vpop.f32.mrf.mxu0 }
 0x4e0   :  { %v1982_v42 = vpop.eup %1981  ;;  %v1132_v43 = vadd.f32 %v1953_v36, %v1131_v41 }
 0x4e1   :  { %v1143_v35 = vrot.slane %v1982_v42, 4  ;;  %1146 = vst [vmem:[#allocation1] ss:$2 sm:$0xff] %v1982_v42 }
 0x4e2   :  { %1983 = vtanh.f32 %v1132_v43 }
 0x4e3   :  { %1148 = vst [vmem:[#allocation1 + $0x1] ss:$2 sm:$0xff] %v1143_v35 }
 0x4e7   :  { %v1134_v44 = vpop.f32.mrf.mxu0 }
 0x4e8   :  { %v1984_v45 = vpop.eup %1983  ;;  %v1135_v9 = vadd.f32 %v1953_v36, %v1134_v44 }
 0x4e9   :  { %v1144_v7 = vrot.slane %v1984_v45, 4  ;;  %1150 = vst [vmem:[#allocation1 + $0x10] ss:$2 sm:$0xff] %v1984_v45 }
 0x4ea   :  { %1985 = vtanh.f32 %v1135_v9  ;;  %v1151_v46 = vld.sshfl [vmem:[#allocation1] sm:$0xff pattern:$0x75316420] }
 0x4eb   :  { %1154 = vst [vmem:[#allocation1 + $0x20] ss:$2 sm:$0xff] %v1144_v7  ;;  %v1165_v48 = vpack.c.bf16 %v1151_v46, %v1151_v46 }
 0x4ed   :  { %v1171_v51 = vunpack.c.l.b16 %v1165_v48 }
 0x4ef   :  { %v1260_v8 = vpop.f32.mrf.mxu0 }
 0x4f0   :  { %v1986_v49 = vpop.eup %1985  ;;  %v1152_v19 = vld.sshfl [vmem:[#allocation1 + $0x10] sm:$0xff pattern:$0x75316420] }
 0x4f1   :  { %v1145_v50 = vrot.slane %v1986_v49, 4  ;;  %1156 = vst [vmem:[#allocation1 + $0x21] ss:$2 sm:$0xff] %v1986_v49  ;;  %v1166_v25 = vpack.c.bf16 %v1152_v19, %v1152_v19 }
 0x4f2   :  { %1307 = vst [vmem:[#allocation1 + $0x10] ss:$2 sm:$0xff] %v1984_v45 }
 0x4f3   :  { %1158 = vst [vmem:[#allocation1 + $0x30] ss:$2 sm:$0xff] %v1145_v50  ;;  %v1172_v52 = vunpack.c.l.b16 %v1166_v25 }
 0x4f5   :  { %v1173_v53 = vpack.c.b16 %v1172_v52, %v1171_v51  ;;  %v1583_v52 = vld [vmem:[#allocation2 + $0x118] sm:$0xff] }
 0x4f7   :  { %v1175_v11 = vsel %vm104_vm0, %v1173_v53, 0 }
 0x4f8   :  { %1184 = vmatpush.bf16.msrb.mxu1 %v1175_v11  ;;  %v1159_v13 = vld.sshfl [vmem:[#allocation1 + $0x20] sm:$0xff pattern:$0x75316420] }
 0x4f9   :  { %v1309_v14 = vld.sshfl [vmem:[#allocation1 + $0x10] sm:$0xff pattern:$0x75316420]  ;;  %v1167_v17 = vpack.c.bf16 %v1159_v13, %v1159_v13 }
 0x4fa   :  { %1341 = vst [vmem:[#allocation1 + $0x10] ss:$2 sm:$0xff] %v1145_v50  ;;  %v1160_v18 = vld.sshfl [vmem:[#allocation1 + $0x30] sm:$0xff pattern:$0x75316420] }
 0x4fb   :  { %v1168_v10 = vpack.c.bf16 %v1160_v18, %v1160_v18  ;;  %1911 = vmatmul.msk.bf16.vlgmr.msrb.gmra.mxu1 %vm97_vm1, %v2304_v38  ;;  %v1192_v54 = vunpack.c.l.b16 %v1167_v17  ;;  %v1956_v18 = vld [vmem:[#allocation2 + $0xf0] ss:$0 sm:$0xff] }
 0x4fc   :  { %1915 = vmatpush.msk.msra.mxu1 %vm177_vm2, %v1263_v58 }
 0x4fd   :  { %v1193_v55 = vunpack.c.l.b16 %v1168_v10 }
 0x4fe   :  { %1452 = vmatpush.msrb.mxu1 %v1432_v29 }
 0x4ff   :  { %v1194_v12 = vpack.c.b16 %v1193_v55, %v1192_v54 }
 0x500   :  { %1453 = vmatpush.msrb.mxu1 %v1431_v3 }
 0x501   :  { %v1343_v16 = vld.sshfl [vmem:[#allocation1 + $0x10] sm:$0xff pattern:$0x75316420]  ;;  %v1196_v56 = vsel %vm104_vm0, %v1194_v12, 0  ;;  %vm1805_vm0 = vcmask 130112  }
 0x502   :  { %1919 = vmatpush.msk.msrb.mxu3 %vm1314_vm10, %v1343_v16  ;;  %1205 = vmatpush.bf16.msrb.mxu2 %v1196_v56 }
 0x503   :  { %1528 = vmatpush.bf16.msrb.mxu0 %v1196_v56 }
 0x505   :  { %1912 = vmatmul.msk.bf16.vlgmr.msrb.gmra.mxu2 %vm97_vm1, %v2312_v47 }
 0x506   :  { %1917 = vmatpush.msk.msra.mxu2 %vm1314_vm10, %v1309_v14 }
 0x578   :  { %v1186_v57 = vpop.f32.mrf.mxu1 }
 0x579   :  { %1215 = vst [vmem:[#allocation1] ss:$2 sm:$0xff] %v1186_v57 }
 0x580   :  { %v1188_v38 = vpop.f32.mrf.mxu1 }
 0x588   :  { %v1207_v28 = vpop.f32.mrf.mxu2 }
 0x589   :  { %1217 = vst [vmem:[#allocation1 + $0x1] ss:$2 sm:$0xff] %v1207_v28  ;;  %v1957_v28 = vld [vmem:[#allocation2 + $0x108] ss:$0 sm:$0xff] }
 0x590   :  { %v1218_v59 = vld.sshfl [vmem:[#allocation1] sm:$0xff pattern:$0x75316420]  ;;  %v1209_v60 = vpop.f32.mrf.mxu2 }
 0x591   :  { %1264 = vst [vmem:[#allocation1] ss:$2 sm:$0xff] %v2328_v22  ;;  %1913 = vmatmul.msk.f32.vlgmr.msra.gmra.mxu3 %vm661_vm9, %v1218_v59  ;;  %v1395_v22 = vld [vmem:[%s2455_s9 + $0x1] sm:$0x1] }
 0x592   :  { %1266 = vst [vmem:[#allocation1 + $0x1] ss:$2 sm:$0xff] %v2333_v34 }
 0x599   :  { %v1267_v61 = vld.sshfl [vmem:[#allocation1] sm:$0xff pattern:$0x75316420] }
 0x59a   :  { %1305 = vst [vmem:[#allocation1 + $0x1] ss:$2 sm:$0xff] %v1143_v35  ;;  %1916 = vmatmul.msk.f32.vlgmr.msra.gmra.mxu1 %vm486_vm7, %v1267_v61 }
 0x59b   :  { %1303 = vst [vmem:[#allocation1] ss:$2 sm:$0xff] %v1982_v42 }
 0x5a2   :  { %v1308_v47 = vld.sshfl [vmem:[#allocation1] sm:$0xff pattern:$0x75316420] }
 0x5a3   :  { %1332 = vmatpush.msra.mxu2 %v1308_v47  ;;  %1337 = vst [vmem:[#allocation1] ss:$2 sm:$0xff] %v1144_v7  ;;  %v1540_v7 = vld [vmem:[#allocation2 + $0x110] sm:$0xff] }
 0x5a4   :  { %1339 = vst [vmem:[#allocation1 + $0x1] ss:$2 sm:$0xff] %v1986_v49  ;;  %1918 = vmatmul.msk.f32.vlgmr.msra.gmra.mxu2 %vm97_vm1, %v1301_v1  ;;  %1570 = vmatpush.msra.mxu1 %v1540_v7 }
 0x5a5   :  { %1476 = vmatpush.msrb.mxu2 %v1459_v2 }
 0x5a7   :  { %1477 = vmatpush.msrb.mxu2 %v1458_v4 }
 0x5a9   :  { %1607 = vmatpush.msra.mxu2 %v1583_v52 }
 0x5ab   :  { %v1342_v63 = vld.sshfl [vmem:[#allocation1] sm:$0xff pattern:$0x75316420] }
 0x5ac   :  { %1365 = vmatpush.msrb.mxu3 %v1342_v63  ;;  %1401 = vst [vmem:[#allocation1] ss:$9 sm:$0xff] %v1394_v62 }
 0x5ad   :  { %1403 = vst [vmem:[#allocation1 + $0x1] ss:$9 sm:$0xff] %v1395_v22  ;;  %1920 = vmatmul.msk.f32.vlgmr.msrb.gmra.mxu3 %vm97_vm1, %v1302_v0 }
 0x5ae   :  { %1512 = vmatpush.bf16.msra.mxu3 %v1175_v11 }
 0x5b4   :  { %v1404_v34 = vld [vmem:[#allocation1] sm:$0xff] }
 0x5b5   :  { %1922 = vmatmul.msk.f32.vlgmr.msra.gmra.mxu0 %vm173_vm3, %v1404_v34  ;;  %1925 = vmatmul.msk.bf16.vlgmr.msra.gmra.mxu3 %vm97_vm1, %v1482_v5 }
 0x5bd   :  { %1926 = vmatmul.msk.bf16.vlgmr.msrb.gmra.mxu0 %vm97_vm1, %v1483_v6  ;;  %vm1812_vm1 = vcmask 90112  }
 0x614   :  { %v1238_v24 = vpop.f32.mrf.mxu3 }
 0x615   :  { %v1261_v27 = vadd.f32 %v1260_v8, %v1238_v24 }
 0x617   :  { %v1290_v30 = vpop.f32.mrf.mxu1 }
 0x618   :  { %v1293_v31 = vadd.f32 %v1290_v30, %v1261_v27  ;;  %v1656_v30 = vld [vmem:[#allocation2 + $0x140] sm:$0xff] }
 0x61a   :  { %v1296_v36 = vadd.f32 %v1954_v32, %v1293_v31  ;;  %v1655_v31 = vld [vmem:[#allocation2 + $0x138] sm:$0xff]  ;;  %v1654_v32 = vld [vmem:[#allocation2 + $0x130] sm:$0xff] }
 0x627   :  { %v1334_v13 = vpop.f32.mrf.mxu2 }
 0x630   :  { %v1367_v33 = vpop.f32.mrf.mxu3 }
 0x631   :  { %v1486_v14 = vrot.slane %v1367_v33, 7  ;;  %v1653_v33 = vld [vmem:[#allocation2 + $0x128] sm:$0xff] }
 0x632   :  { %v1427_v20 = vpop.f32.mrf.mxu0 }
 0x633   :  { %v1428_v21 = vadd.f32 %v1955_v15, %v1427_v20  ;;  %v1488_v12 = vsel %vm1487_vm12, %v1486_v14, %v1334_v13 }
 0x635   :  { %1987 = vtanh.f32 %v1428_v21 }
 0x636   :  { %1989 = vtanh.f32 %v1296_v36 }
 0x637   :  { %1991 = vrcp.f32 %v2066_v26 }
 0x638   :  { %v1514_v37 = vpop.f32.mrf.mxu3 }
 0x63a   :  { %v1530_v39 = vpop.f32.mrf.mxu0 }
 0x63b   :  { %v1988_v23 = vpop.eup %1987 }
 0x63c   :  { %1923 = vmatmul.msk.f32.vlgmr.msrb.gmra.mxu1 %vm537_vm8, %v1988_v23  ;;  %1924 = vmatmul.msk.f32.vlgmr.msrb.gmra.mxu2 %vm537_vm8, %v1988_v23  ;;  %v2425_v40 = vpop.eup %1989 }
 0x63d   :  { %v1299_v41 = vrot.slane %v2425_v40, 4  ;;  %v1371_v44 = vsel %vm1370_vm11, %v2425_v40, 0.0  ;;  %v1992_v46 = vpop.eup %1991  ;;  %1698 = vmatpush.msrb.mxu1 %v1656_v30 }
 0x63e   :  { %v1372_v9 = vrot.slane %v1371_v44, 4  ;;  %v1386_v19 = vmul.f32 4.0, %v1992_v46  ;;  %vm1390_vm13 = vweird.f32 %v1992_v46 }
 0x63f   :  { %v1378_v35 = vsel %vm1370_vm11, %v1299_v41, 0.0  ;;  %1699 = vmatpush.msrb.mxu1 %v1655_v31 }
 0x640   :  { %v1516_v42 = vpop.f32.mrf.mxu3  ;;  %v1379_v45 = vrot.slane %v1378_v35, 4  ;;  %v1373_v49 = vadd.f32 %v1372_v9, %v1371_v44  ;;  %v1387_v51 = vsub.f32 1.0, %v1386_v19  ;;  %v1958_v44 = vld [vmem:[#allocation2 + $0x120] ss:$0 sm:$0xff] }
 0x641   :  { %1700 = vmatpush.msrb.mxu1 %v1654_v32 }
 0x642   :  { %v1532_v43 = vpop.f32.mrf.mxu0  ;;  %v1380_v48 = vadd.f32 %v1379_v45, %v1378_v35  ;;  %v1374_v25 = vrot.slane %v1373_v49, 2  ;;  %v1388_v17 = vmul.f32 %v1992_v46, %v1387_v51 }
 0x643   :  { %1701 = vmatpush.msrb.mxu1 %v1653_v33 }
 0x644   :  { %v1381_v50 = vrot.slane %v1380_v48, 2  ;;  %v1375_v11 = vadd.f32 %v1374_v25, %v1373_v49  ;;  %v1389_v16 = vadd.f32 %v1992_v46, %v1388_v17 }
 0x646   :  { %v1382_v53 = vadd.f32 %v1381_v50, %v1380_v48  ;;  %v1376_v54 = vrot.slane %v1375_v11, 1  ;;  %v1391_v59 = vsel %vm1390_vm13, %v1992_v46, %v1389_v16 }
 0x648   :  { %v1383_v10 = vrot.slane %v1382_v53, 1  ;;  %v1377_v38 = vadd.f32 %v1376_v54, %v1375_v11  ;;  %v2067_v54 = vmov 0  }
 0x649   :  { %1946 = vset.pattern.permute.xlu0 %v2067_v54  ;;  %1947 = vset.pattern.permute.xlu2 %v2067_v54 }
 0x64a   :  { %v1384_v57 = vadd.f32 %v1383_v10, %v1382_v53  ;;  %v1392_v22 = vmul.f32 %v1391_v59, %v1377_v38  ;;  %1948 = vset.pattern.permute.xlu1 %v2067_v54 }
 0x64c   :  { %v1393_v60 = vmul.f32 %v1391_v59, %v1384_v57 }
 0x64e   :  { %v1493_v1 = vsel %vm1487_vm12, %v1393_v60, %v1392_v22  ;;  %v1959_v60 = vld [vmem:[#allocation2 + $0x148] ss:$0 sm:$0xff] }
 0x6b9   :  { %v1455_v55 = vpop.f32.mrf.mxu1 }
 0x6ba   :  { %v1456_v56 = vadd.f32 %v1956_v18, %v1455_v55  ;;  %v1773_v18 = vld [vmem:[#allocation2 + $0x158] sm:$0x1] }
 0x6bb   :  { %1776 = vperm.xlu0 %1946, %v1773_v18  }
 0x6bc   :  { %v1490_v58 = vsub.f32 %v1456_v56, %v1488_v12 }
 0x6be   :  { %v1498_v61 = vperm.slane %v1490_v58, 0  ;;  %v1497_v47 = vrot.slane %v1490_v58, 1 }
 0x6bf   :  { %v1479_v62 = vpop.f32.mrf.mxu2 }
 0x6c0   :  { %v1480_v63 = vadd.f32 %v1957_v28, %v1479_v62  ;;  %v1515_v34 = vadd.f32 %v1514_v37, %v1498_v61  ;;  %v1499_v0 = vperm.slane %v1497_v47, 0  ;;  %v1960_v62 = vld [vmem:[#allocation2 + $0x150] ss:$0 sm:$0xff] }
 0x6c1   :  { %v1727_v22 = vrot.slane %v1960_v62, 4 }
 0x6c2   :  { %v1536_v29 = vrot.slane %v1515_v34, 1  ;;  %v1537_v2 = vrot.slane %v1515_v34, 2  ;;  %1541 = vst [vmem:[#allocation1] ss:$9 sm:$0xff] %v1515_v34  ;;  %v1531_v3 = vadd.f32 %v1530_v39, %v1499_v0  ;;  %v1495_v4 = vsub.f32 %v1480_v63, %v1493_v1 }
 0x6c4   :  { %1543 = vst [vmem:[#allocation1 + $0x1] ss:$9 sm:$0xff] %v1536_v29  ;;  %v1538_v5 = vrot.slane %v1531_v3, 1  ;;  %v1539_v6 = vrot.slane %v1531_v3, 2  ;;  %v1576_v8 = vrot.slane %v1495_v4, 1  ;;  %v1577_v15 = vperm.slane %v1495_v4, 0 }
 0x6c5   :  { %1545 = vst [vmem:[#allocation1 + $0x2] ss:$9 sm:$0xff] %v1537_v2 }
 0x6c6   :  { %1547 = vst [vmem:[#allocation1 + $0x3] ss:$9 sm:$0xff] %v1531_v3  ;;  %v1578_v20 = vperm.slane %v1576_v8, 0  ;;  %v1581_v21 = vadd.f32 %v2425_v40, %v1577_v15 }
 0x6c7   :  { %1549 = vst [vmem:[#allocation1 + $0x4] ss:$9 sm:$0xff] %v1538_v5 }
 0x6c8   :  { %1551 = vst [vmem:[#allocation1 + $0x5] ss:$9 sm:$0xff] %v1539_v6  ;;  %v1582_v23 = vadd.f32 %v1578_v20, %v1299_v41 }
 0x6cf   :  { %v1552_v24 = vld [vmem:[#allocation1] sm:$0xff] }
 0x6d0   :  { %1927 = vmatmul.msk.f32.vlgmr.msra.gmra.mxu1 %vm661_vm9, %v1552_v24  ;;  %1586 = vst [vmem:[#allocation1] ss:$2 sm:$0xff] %v1581_v21 }
 0x6d1   :  { %1588 = vst [vmem:[#allocation1 + $0x1] ss:$2 sm:$0xff] %v1582_v23 }
 0x6d8   :  { %v1589_v27 = vld.sshfl [vmem:[#allocation1] sm:$0xff pattern:$0x75316420] }
 0x6d9   :  { %1928 = vmatmul.msk.f32.vlgmr.msra.gmra.mxu2 %vm661_vm9, %v1589_v27 }
 0x74d   :  { %v1572_v36 = vpop.f32.mrf.mxu1 }
 0x74e   :  { %v1613_v37 = vrot.slane %v1572_v36, 1  ;;  %v1614_v39 = vrot.slane %v1572_v36, 2  ;;  %v1615_v40 = vrot.slane %v1572_v36, 3  ;;  %v1616_v41 = vrot.slane %v1572_v36, 4 }
 0x74f   :  { %v1617_v42 = vrot.slane %v1572_v36, 5  ;;  %v1621_v43 = vperm.slane %v1572_v36, 0 }
 0x750   :  { %v1622_v35 = vperm.slane %v1613_v37, 0  ;;  %v1623_v26 = vperm.slane %v1614_v39, 0  ;;  %v1624_v9 = vperm.slane %v1615_v40, 0  ;;  %v1625_v7 = vperm.slane %v1616_v41, 0  ;;  %v1777_v40 = vpop.permute.xlu0 %1776 }
 0x751   :  { %v1626_v46 = vperm.slane %v1617_v42, 0  ;;  %v1778_v41 = vperm.slane %v1777_v40, 0 }
 0x75c   :  { %v1609_v45 = vpop.f32.mrf.mxu2 }
 0x75d   :  { %v1619_v48 = vrot.slane %v1609_v45, 4  ;;  %v1633_v49 = vadd.f32 %v1621_v43, %v1609_v45  ;;  %v1634_v19 = vadd.f32 %v1622_v35, %v1609_v45  ;;  %v1635_v50 = vadd.f32 %v1623_v26, %v1609_v45 }
 0x75f   :  { %v1636_v25 = vadd.f32 %v1624_v9, %v1619_v48  ;;  %v1637_v51 = vadd.f32 %v1625_v7, %v1619_v48  ;;  %v1638_v52 = vadd.f32 %v1626_v46, %v1619_v48  ;;  %v1641_v53 = vadd.f32 %v1958_v44, %v1633_v49 }
 0x760   :  { %v1642_v11 = vadd.f32 %v1958_v44, %v1634_v19  ;;  %v1643_v13 = vadd.f32 %v1958_v44, %v1635_v50  ;;  %v1800_v48 = vlaneseq }
 0x761   :  { %v1644_v14 = vadd.f32 %v1958_v44, %v1636_v25  ;;  %v1645_v17 = vadd.f32 %v1958_v44, %v1637_v51  ;;  %1993 = vtanh.f32 %v1641_v53  ;;  %v1646_v10 = vadd.f32 %v1958_v44, %v1638_v52 }
 0x762   :  { %1995 = vtanh.f32 %v1642_v11  ;;  %v1801_v19 = vand.u32 127, %v1800_v48 }
 0x763   :  { %1997 = vtanh.f32 %v1643_v13 }
 0x764   :  { %1999 = vtanh.f32 %v1644_v14  ;;  %v1803_v50 = vadd.s32 4294967288, %v1801_v19 }
 0x765   :  { %2001 = vtanh.f32 %v1645_v17 }
 0x766   :  { %2003 = vtanh.f32 %v1646_v10 }
 0x767   :  { %v1994_v55 = vpop.eup %1993 }
 0x768   :  { %v1996_v12 = vpop.eup %1995  ;;  %1665 = vst [vmem:[#allocation1] ss:$2 sm:$0xff] %v1994_v55 }
 0x769   :  { %v1998_v16 = vpop.eup %1997  ;;  %1667 = vst [vmem:[#allocation1 + $0x1] ss:$2 sm:$0xff] %v1996_v12 }
 0x76a   :  { %v2000_v56 = vpop.eup %1999  ;;  %1669 = vst [vmem:[#allocation1 + $0x10] ss:$2 sm:$0xff] %v1998_v16 }
 0x76b   :  { %v2002_v57 = vpop.eup %2001  ;;  %1671 = vst [vmem:[#allocation1 + $0x11] ss:$2 sm:$0xff] %v2000_v56 }
 0x76c   :  { %v2004_v58 = vpop.eup %2003  ;;  %1673 = vst [vmem:[#allocation1 + $0x20] ss:$2 sm:$0xff] %v2002_v57 }
 0x76d   :  { %1675 = vst [vmem:[#allocation1 + $0x21] ss:$2 sm:$0xff] %v2004_v58 }
 0x770   :  { %v1676_v38 = vld.sshfl [vmem:[#allocation1] sm:$0xff pattern:$0x75316420] }
 0x771   :  { %1929 = vmatmul.msk.f32.vlgmr.msrb.gmra.mxu1 %vm1679_vm14, %v1676_v38 }
 0x772   :  { %v1677_v28 = vld.sshfl [vmem:[#allocation1 + $0x10] sm:$0xff pattern:$0x75316420] }
 0x774   :  { %v1678_v59 = vld.sshfl [vmem:[#allocation1 + $0x20] sm:$0xff pattern:$0x75316420] }
 0x779   :  { %1930 = vmatmul.msk.f32.gmra.mxu1 %vm1679_vm14, %v1677_v28 }
 0x781   :  { %1931 = vmatmul.msk.f32.gmra.mxu1 %vm1679_vm14, %v1678_v59 }
 0x7ee   :  { %v1703_v61 = vpop.f32.mrf.mxu1 }
 0x7ef   :  { %v1704_v47 = vadd.f32 %v1959_v60, %v1703_v61 }
 0x7f1   :  { %2005 = vtanh.f32 %v1704_v47 }
 0x7f6   :  { %v1706_v63 = vpop.f32.mrf.mxu1 }
 0x7f7   :  { %v2006_v34 = vpop.eup %2005  ;;  %v1707_v0 = vadd.f32 %v1959_v60, %v1706_v63 }
 0x7f8   :  { %v1718_v1 = vrot.slane %v2006_v34, 4  ;;  %v1729_v29 = vmul.f32 %v2006_v34, %v1960_v62 }
 0x7f9   :  { %2007 = vtanh.f32 %v1707_v0 }
 0x7fa   :  { %v1730_v2 = vmul.f32 %v1727_v22, %v1718_v1  ;;  %1741 = vst [vmem:[#allocation1] ss:$2 sm:$0xff] %v1729_v29 }
 0x7fc   :  { %1743 = vst [vmem:[#allocation1 + $0x1] ss:$2 sm:$0xff] %v1730_v2 }
 0x7fe   :  { %v1709_v3 = vpop.f32.mrf.mxu1 }
 0x7ff   :  { %v2008_v4 = vpop.eup %2007  ;;  %v1710_v5 = vadd.f32 %v1959_v60, %v1709_v3 }
 0x800   :  { %v1719_v6 = vrot.slane %v2008_v4, 4  ;;  %v1731_v8 = vmul.f32 %v2008_v4, %v1960_v62 }
 0x801   :  { %2009 = vtanh.f32 %v1710_v5 }
 0x802   :  { %v1732_v15 = vmul.f32 %v1960_v62, %v1719_v6  ;;  %1745 = vst [vmem:[#allocation1 + $0x10] ss:$2 sm:$0xff] %v1731_v8 }
 0x803   :  { %v1746_v20 = vld.sshfl [vmem:[#allocation1] sm:$0xff pattern:$0x75316420] }
 0x804   :  { %1749 = vst [vmem:[#allocation1 + $0x20] ss:$2 sm:$0xff] %v1732_v15  ;;  %v1760_v21 = vsel %vm1679_vm14, %v1746_v20, 0.0 }
 0x805   :  { %1761 = vadd.xlane.f32.xlu0 %v1760_v21 }
 0x807   :  { %v2010_v23 = vpop.eup %2009 }
 0x808   :  { %v1720_v24 = vrot.slane %v2010_v23, 4  ;;  %v1733_v27 = vmul.f32 %v2010_v23, %v1727_v22 }
 0x809   :  { %v1747_v30 = vld.sshfl [vmem:[#allocation1 + $0x10] sm:$0xff pattern:$0x75316420] }
 0x80a   :  { %v1734_v31 = vmul.f32 %v1960_v62, %v1720_v24  ;;  %1751 = vst [vmem:[#allocation1 + $0x21] ss:$2 sm:$0xff] %v1733_v27  ;;  %v1764_v32 = vsel %vm1763_vm15, %v1747_v30, 0.0 }
 0x80b   :  { %1765 = vadd.xlane.f32.xlu1 %v1764_v32 }
 0x80c   :  { %1753 = vst [vmem:[#allocation1 + $0x30] ss:$2 sm:$0xff] %v1734_v31 }
 0x811   :  { %v1754_v33 = vld.sshfl [vmem:[#allocation1 + $0x20] sm:$0xff pattern:$0x75316420] }
 0x812   :  { %v1767_v36 = vsel %vm1679_vm14, %v1754_v33, 0.0 }
 0x813   :  { %1768 = vadd.xlane.f32.xlu1 %v1767_v36  ;;  %v1755_v37 = vld.sshfl [vmem:[#allocation1 + $0x30] sm:$0xff pattern:$0x75316420] }
 0x814   :  { %v1770_v39 = vsel %vm1763_vm15, %v1755_v37, 0.0 }
 0x815   :  { %1771 = vadd.xlane.f32.xlu2 %v1770_v39 }
 0x878   :  { %v1762_v42 = vpop.xlane.xlu0 %1761 }
 0x879   :  { %v1780_v43 = vadd.f32 %v1778_v41, %v1762_v42 }
 0x87b   :  { %1789 = vperm.xlu2 %1947, %v1780_v43  }
 0x87e   :  { %v1766_v35 = vpop.xlane.xlu1 %1765 }
 0x87f   :  { %v1781_v26 = vadd.f32 %v1778_v41, %v1766_v35 }
 0x881   :  { %1792 = vperm.xlu1 %1948, %v1781_v26  }
 0x886   :  { %v1769_v44 = vpop.xlane.xlu1 %1768 }
 0x887   :  { %v1782_v45 = vadd.f32 %v1778_v41, %v1769_v44 }
 0x888   :  { %v1772_v9 = vpop.xlane.xlu2 %1771 }
 0x889   :  { %1795 = vperm.xlu2 %1947, %v1782_v45   ;;  %v1783_v7 = vadd.f32 %v1778_v41, %v1772_v9 }
 0x891   :  { %1798 = vperm.xlu2 %1947, %v1783_v7  }
 0x8d5   :  { %v1790_v46 = vpop.permute.xlu2 %1789 }
 0x8d6   :  { %v1802_v13 = vperm.slane %v1790_v46, %v1801_v19 }
 0x8e3   :  { %v1796_v49 = vpop.permute.xlu2 %1795 }
 0x8e4   :  { %v1807_v51 = vperm.slane %v1796_v49, %v1801_v19 }
 0x8eb   :  { %v1799_v25 = vpop.permute.xlu2 %1798 }
 0x8ec   :  { %v1808_v52 = vperm.slane %v1799_v25, %v1803_v50 }
 0x8ee   :  { %v1809_v53 = vsel %vm1805_vm0, %v1808_v52, %v1807_v51 }
 0x8ef   :  { %1814 = vst.msk [vmem:[#allocation5 + $0x1] sm:$0x1] %vm1812_vm1, %v1809_v53 }
 0x8f3   :  { %v1793_v11 = vpop.permute.xlu1 %1792 }
 0x8f4   :  { %v1804_v14 = vperm.slane %v1793_v11, %v1803_v50 }
 0x8f6   :  { %v1806_v17 = vsel %vm1805_vm0, %v1804_v14, %v1802_v13 }
 0x8f7   :  { %1813 = vst.msk [vmem:[#allocation5] sm:$0x1] %vm1812_vm1, %v1806_v17 }
 0x8f8   :  { %1827 = dma.vmem_to_hbm [thread:$0]  %s1820_s8, 32, %s1822_s29, [#allocation4], %s2069_s30, %s2069_s30, %s2070_s12  }
 0x8f9   :  { %2061 = dma.done.wait [#allocation4], 32  }
 0x8fa   :  { %2062 = vsyncadd [#allocation4], 4294967264 }
 0x8fb   :  { %1832 = vsyncpa [#allocation3], 1 }
 0x8fc   :  { %1833 = vsyncpa [#allocation4], 1 }

</bundles_post_ra>
